<compile_context>
chip_gen: v5e
topology: v5e:2x2
jax: 0.10.0
libtpu: 0.0.40
codegen_flags: <defaults>
</compile_context>

<pallas_src>
import functools
import math

import jax
import jax.numpy as jnp
from jax import lax
from jax.experimental import pallas as pl
from jax.experimental.pallas import tpu as pltpu


def _round_up(x, m):
    return (x + m - 1) // m * m


def _lstm_encoder_kernel(
    gi0_ref,     # (T, BB, G)  f32 : x @ W_ih_l0^T + b_ih_l0 + b_hh_l0, time-major, packed gates
    whh0_ref,    # (H, G)      bf16: W_hh_l0^T
    w1_ref,      # (2H, G)     bf16: [W_ih_l1^T ; W_hh_l1^T] stacked (fused layer-1 matmul)
    b1_ref,      # (1, G)      f32 : b_ih_l1 + b_hh_l1
    gamma_ref,   # (1, H)      f32 : LayerNorm weight
    beta_ref,    # (1, H)      f32 : LayerNorm bias
    out_ref,     # (BB, OUTP)  f32 : lane-dense output block, true features in lanes [0, H)
    *,
    hidden: int,
    seq_len: int,
    eps: float,
):
    H, T = hidden, seq_len
    G = 4 * H
    BB, OUTP = out_ref.shape

    # Hoisted bias broadcast (done once, not per step).
    b1 = jnp.broadcast_to(b1_ref[...], (BB, G))

    def lstm_cell(gates, c_prev):
        # Packed 128-lane gate vector (PyTorch order i|f|g|o): one sigmoid + one tanh over the
        # whole vector (2 EUP ops), then static per-gate lane slices (XLU lane ops, idle unit).
        sig = jax.nn.sigmoid(gates)
        th = jnp.tanh(gates)
        i = sig[:, 0 * H:1 * H]
        f = sig[:, 1 * H:2 * H]
        g = th[:, 2 * H:3 * H]
        o = sig[:, 3 * H:4 * H]
        c = f * c_prev + i * g
        h = o * jnp.tanh(c)
        return h, c

    h0 = jnp.zeros((BB, H), jnp.float32)
    c0 = jnp.zeros((BB, H), jnp.float32)
    h1 = jnp.zeros((BB, H), jnp.float32)
    c1 = jnp.zeros((BB, H), jnp.float32)

    # Fully unrolled time loop (T small & static): static time indices and cross-step scheduling
    # for the serially-dependent matmuls / EUP ops.
    for t in range(T):
        # Layer 0: input projection + both layer-0 biases already folded into gi0.
        g0 = gi0_ref[t] + jnp.dot(
            h0.astype(jnp.bfloat16), whh0_ref[...], preferred_element_type=jnp.float32)
        h0, c0 = lstm_cell(g0, c0)
        # Layer 1 (inter-layer dropout = identity at inference): single fused MXU push
        # [h0 | h1] @ [W_ih_l1^T ; W_hh_l1^T].
        hcat = jnp.concatenate([h0, h1], axis=-1).astype(jnp.bfloat16)
        g1 = jnp.dot(hcat, w1_ref[...], preferred_element_type=jnp.float32) + b1
        h1, c1 = lstm_cell(g1, c1)

    # LayerNorm over the true H features of the last-layer, last-timestep hidden state.
    mean = jnp.mean(h1, axis=-1, keepdims=True)
    cen = h1 - mean
    var = jnp.mean(cen * cen, axis=-1, keepdims=True)
    inv = lax.rsqrt(var + eps)
    y = cen * inv * gamma_ref[...] + beta_ref[...]

    # Lane-dense (BB, OUTP) store: true features in lanes [0, H), zeros elsewhere.
    if OUTP > H:
        y = jnp.concatenate([y, jnp.zeros((BB, OUTP - H), jnp.float32)], axis=-1)
    out_ref[...] = y


def lstm_encoder_forward(x, kp, *, hidden, eps=1e-5, out_pad=128):
    """x: (B, T, D_in) float32, batch_first (like PyTorch). Returns (B, hidden) float32."""
    B, T, D = x.shape
    H = hidden
    G = 4 * H
    assert G % 128 == 0, "packed-gate layout assumes 4*hidden is a multiple of the 128-lane tile"

    # Batch blocking: single block at tiny B (grid of 1, zero per-grid-step overhead); otherwise a
    # two-way split (one block per v7x TensorCore), capped at 256 rows (fills v6e/v7x MXU rows).
    B8 = _round_up(B, 8)
    if B8 <= 8:
        batch_block = B8
    else:
        batch_block = min(_round_up(-(-B8 // 2), 8), 256)
    nb = -(-B8 // batch_block)
    B_pad = nb * batch_block
    if B_pad != B:
        x = jnp.concatenate([x, jnp.zeros((B_pad - B, T, D), x.dtype)], axis=0)

    # Hoisted layer-0 input GEMM, produced directly time-major (no separate HBM transpose of x);
    # both layer-0 biases folded in.  Packed gate width G = 4H (no per-gate lane padding).
    gi0 = jnp.einsum("btd,dg->tbg", x.astype(jnp.float32), kp["wih0_t"]) + kp["b0"]

    # VMEM budget sized from the actual (double-buffered) blocks, with headroom for the
    # unrolled-loop temporaries; stays well under v7x's 64 MiB even with both TCs active.
    block_bytes = (
        2 * T * batch_block * G * 4          # gi0 block
        + 2 * (H * G + 2 * H * G) * 2        # bf16 recurrent weights
        + 2 * 3 * G * 4                      # b1 / gamma / beta rows
        + 2 * batch_block * out_pad * 4      # output block
    )
    vmem_limit = min(max(4 * 1024 * 1024, 4 * block_bytes), 64 * 1024 * 1024)

    kernel = functools.partial(_lstm_encoder_kernel, hidden=H, seq_len=T, eps=eps)

    out = pl.pallas_call(
        kernel,
        out_shape=jax.ShapeDtypeStruct((B_pad, out_pad), jnp.float32),
        grid_spec=pltpu.PrefetchScalarGridSpec(
            num_scalar_prefetch=0,
            grid=(nb,),
            in_specs=[
                pl.BlockSpec((T, batch_block, G), lambda b: (0, b, 0)),   # gi0
                pl.BlockSpec((H, G), lambda b: (0, 0)),                   # W_hh_l0^T (bf16)
                pl.BlockSpec((2 * H, G), lambda b: (0, 0)),               # [W_ih_l1^T; W_hh_l1^T] (bf16)
                pl.BlockSpec((1, G), lambda b: (0, 0)),                   # b1
                pl.BlockSpec((1, H), lambda b: (0, 0)),                   # gamma
                pl.BlockSpec((1, H), lambda b: (0, 0)),                   # beta
            ],
            out_specs=pl.BlockSpec((batch_block, out_pad), lambda b: (b, 0)),
        ),
        compiler_params=pltpu.CompilerParams(
            dimension_semantics=("parallel",),   # batch blocks split across TCs (v7x megacore)
            vmem_limit_bytes=vmem_limit,
        ),
    )(gi0, kp["whh0_t"], kp["w1_t"], kp["b1"], kp["gamma"], kp["beta"])
    return out[:B, :H]


def init_torch_params(key, input_dim, d_model):
    """PyTorch-shaped LSTM params, U(-1/sqrt(H), 1/sqrt(H)) like nn.LSTM; LayerNorm gamma/beta."""
    H = d_model
    k = 1.0 / math.sqrt(H)
    keys = jax.random.split(key, 8)
    u = lambda kk, shape: jax.random.uniform(kk, shape, jnp.float32, minval=-k, maxval=k)
    return {
        "w_ih_l0": u(keys[0], (4 * H, input_dim)),
        "w_hh_l0": u(keys[1], (4 * H, H)),
        "b_ih_l0": u(keys[2], (4 * H,)),
        "b_hh_l0": u(keys[3], (4 * H,)),
        "w_ih_l1": u(keys[4], (4 * H, H)),
        "w_hh_l1": u(keys[5], (4 * H, H)),
        "b_ih_l1": u(keys[6], (4 * H,)),
        "b_hh_l1": u(keys[7], (4 * H,)),
        "gamma": jnp.ones((H,), jnp.float32),
        "beta": jnp.zeros((H,), jnp.float32),
    }


def prepare_kernel_params(tp, *, hidden):
    """Transpose PyTorch weights into the packed-gate kernel layout.

    Recurrent matmul weights are stored bf16 (MXU-native); layer-1 input & recurrent weights are
    stacked into a single (2H, 4H) matrix for the fused per-step matmul.
    """
    H = hidden
    f32 = jnp.float32
    return {
        "wih0_t": tp["w_ih_l0"].T.astype(f32),                                   # (D_in, 4H) wrapper GEMM
        "b0": (tp["b_ih_l0"] + tp["b_hh_l0"]).reshape(1, 4 * H).astype(f32),
        "whh0_t": tp["w_hh_l0"].T.astype(jnp.bfloat16),                          # (H, 4H)
        "w1_t": jnp.concatenate([tp["w_ih_l1"].T, tp["w_hh_l1"].T],
                                axis=0).astype(jnp.bfloat16),                    # (2H, 4H)
        "b1": (tp["b_ih_l1"] + tp["b_hh_l1"]).reshape(1, 4 * H).astype(f32),
        "gamma": tp["gamma"].reshape(1, H).astype(f32),
        "beta": tp["beta"].reshape(1, H).astype(f32),
    }


def reference_forward(x, tp, *, hidden, eps=1e-5, rec_dtype=jnp.float32):
    """Pure-JAX reference of the same forward pass (PyTorch LSTM semantics).

    rec_dtype controls the precision of the recurrent matmul operands (the layer-0 input
    projection always stays f32, matching the kernel's wrapper-side GEMM): f32 = exact module,
    bf16 = matches the kernel's bf16 MXU operands (f32 accumulation).
    """
    H = hidden
    B, T, _ = x.shape

    def mm(a, b):
        return jnp.dot(a.astype(rec_dtype), b.astype(rec_dtype),
                       preferred_element_type=jnp.float32)

    def act(g):
        i = jax.nn.sigmoid(g[:, 0 * H:1 * H])
        f = jax.nn.sigmoid(g[:, 1 * H:2 * H])
        gg = jnp.tanh(g[:, 2 * H:3 * H])
        o = jax.nn.sigmoid(g[:, 3 * H:4 * H])
        return i, f, gg, o

    h0 = c0 = h1 = c1 = jnp.zeros((B, H), jnp.float32)
    for t in range(T):
        xt = x[:, t, :].astype(jnp.float32)
        g0 = xt @ tp["w_ih_l0"].T + tp["b_ih_l0"] + mm(h0, tp["w_hh_l0"].T) + tp["b_hh_l0"]
        i, f, gg, o = act(g0)
        c0 = f * c0 + i * gg
        h0 = o * jnp.tanh(c0)
        g1 = mm(h0, tp["w_ih_l1"].T) + tp["b_ih_l1"] + mm(h1, tp["w_hh_l1"].T) + tp["b_hh_l1"]
        i, f, gg, o = act(g1)
        c1 = f * c1 + i * gg
        h1 = o * jnp.tanh(c1)

    mean = jnp.mean(h1, axis=-1, keepdims=True)
    var = jnp.mean((h1 - mean) ** 2, axis=-1, keepdims=True)
    return (h1 - mean) / jnp.sqrt(var + eps) * tp["gamma"] + tp["beta"]


if __name__ == "__main__":
    INPUT_DIM = 6
    D_MODEL = 32
    B, T = 2, 8

    root = jax.random.PRNGKey(0)
    k_x, k_p = jax.random.split(root)

    x = jax.random.normal(k_x, (B, T, INPUT_DIM), jnp.float32)
    tparams = init_torch_params(k_p, INPUT_DIM, D_MODEL)
    kparams = prepare_kernel_params(tparams, hidden=D_MODEL)

    out = lstm_encoder_forward(x, kparams, hidden=D_MODEL)
    out = jax.block_until_ready(out)
    assert out.shape == (B, D_MODEL)

    # Tight check vs a reference whose recurrent matmuls use the same bf16 MXU precision as the
    # kernel (validates gate order / fusion / LayerNorm), plus a loose sanity check against the
    # exact f32 module semantics (bf16 rounding gets amplified by the final LayerNorm).
    ref_match = reference_forward(x, tparams, hidden=D_MODEL, rec_dtype=jnp.bfloat16)
    ref_exact = reference_forward(x, tparams, hidden=D_MODEL, rec_dtype=jnp.float32)
    err_match = float(jnp.max(jnp.abs(out - ref_match)))
    err_exact = float(jnp.max(jnp.abs(out - ref_exact)))
    assert err_match < 1e-2, f"mismatch vs precision-matched reference, max abs err = {err_match}"
    assert err_exact < 1e-1, f"mismatch vs exact f32 reference, max abs err = {err_exact}"

    print("KERNEL_OK")
</pallas_src>

<mosaic_0001>
module attributes {stable_mosaic.version = 11 : i64} {
  func.func @_lstm_encoder_kernel(%arg0: i32, %arg1: memref<8x8x128xf32, #tpu.memory_space<vmem>>, %arg2: memref<32x128xbf16, #tpu.memory_space<vmem>>, %arg3: memref<64x128xbf16, #tpu.memory_space<vmem>>, %arg4: memref<1x128xf32, #tpu.memory_space<vmem>>, %arg5: memref<1x32xf32, #tpu.memory_space<vmem>>, %arg6: memref<1x32xf32, #tpu.memory_space<vmem>>, %arg7: memref<8x128xf32, #tpu.memory_space<vmem>>) attributes {dimension_semantics = [#tpu.dimension_semantics<parallel>], iteration_bounds = array<i64: 1>, scalar_prefetch = 0 : i64, scratch_operands = 0 : i64, tpu.core_type = #tpu.core_type<tc>, window_params = [{transform_indices = @transform_0, window_bounds = array<i64: 8, 8, 128>}, {pipeline_mode = #tpu.pipeline_mode<synchronous>, transform_indices = @transform_1, window_bounds = array<i64: 32, 128>}, {pipeline_mode = #tpu.pipeline_mode<synchronous>, transform_indices = @transform_2, window_bounds = array<i64: 64, 128>}, {pipeline_mode = #tpu.pipeline_mode<synchronous>, transform_indices = @transform_3, window_bounds = array<i64: 1, 128>}, {pipeline_mode = #tpu.pipeline_mode<synchronous>, transform_indices = @transform_4, window_bounds = array<i64: 1, 32>}, {pipeline_mode = #tpu.pipeline_mode<synchronous>, transform_indices = @transform_5, window_bounds = array<i64: 1, 32>}, {transform_indices = @transform_6, window_bounds = array<i64: 8, 128>}]} {
    %c0 = arith.constant 0 : index
    %c0_0 = arith.constant 0 : index
    %0 = vector.load %arg4[%c0, %c0_0] : memref<1x128xf32, #tpu.memory_space<vmem>>, vector<1x128xf32>
    %1 = vector.shape_cast %0 : vector<1x128xf32> to vector<1x128xf32>
    %2 = vector.broadcast %1 : vector<1x128xf32> to vector<8x128xf32>
    %cst = arith.constant 0.000000e+00 : f32
    %3 = vector.broadcast %cst : f32 to vector<8x32xf32>
    %cst_1 = arith.constant 0.000000e+00 : f32
    %4 = vector.broadcast %cst_1 : f32 to vector<8x32xf32>
    %cst_2 = arith.constant 0.000000e+00 : f32
    %5 = vector.broadcast %cst_2 : f32 to vector<8x32xf32>
    %cst_3 = arith.constant 0.000000e+00 : f32
    %6 = vector.broadcast %cst_3 : f32 to vector<8x32xf32>
    %c0_4 = arith.constant 0 : index
    %c0_5 = arith.constant 0 : index
    %c0_6 = arith.constant 0 : index
    %7 = vector.load %arg1[%c0_4, %c0_5, %c0_6] : memref<8x8x128xf32, #tpu.memory_space<vmem>>, vector<1x8x128xf32>
    %8 = vector.shape_cast %7 : vector<1x8x128xf32> to vector<8x128xf32>
    %9 = arith.truncf %3 : vector<8x32xf32> to vector<8x32xbf16>
    %c0_7 = arith.constant 0 : index
    %c0_8 = arith.constant 0 : index
    %10 = vector.load %arg2[%c0_7, %c0_8] : memref<32x128xbf16, #tpu.memory_space<vmem>>, vector<32x128xbf16>
    %cst_9 = arith.constant dense<0.000000e+00> : vector<8x128xf32>
    %11 = tpu.matmul %9, %10, %cst_9 {dimension_numbers = #tpu.dot_dimension_numbers<[1], [0], [0], [1], [0, 0, 1, 1], [], []>} : vector<8x32xbf16>, vector<32x128xbf16>, vector<8x128xf32> -> vector<8x128xf32>
    %12 = arith.addf %8, %11 : vector<8x128xf32>
    %13 = arith.negf %12 : vector<8x128xf32>
    %14 = math.exp %13 : vector<8x128xf32>
    %cst_10 = arith.constant 1.000000e+00 : f32
    %15 = vector.broadcast %cst_10 : f32 to vector<8x128xf32>
    %16 = arith.addf %15, %14 : vector<8x128xf32>
    %17 = arith.divf %15, %16 : vector<8x128xf32>
    %18 = math.tanh %12 : vector<8x128xf32>
    %19 = vector.extract_strided_slice %17 {offsets = [0, 0], sizes = [8, 32], strides = [1, 1]} : vector<8x128xf32> to vector<8x32xf32>
    %20 = vector.extract_strided_slice %17 {offsets = [0, 32], sizes = [8, 32], strides = [1, 1]} : vector<8x128xf32> to vector<8x32xf32>
    %21 = vector.extract_strided_slice %18 {offsets = [0, 64], sizes = [8, 32], strides = [1, 1]} : vector<8x128xf32> to vector<8x32xf32>
    %22 = vector.extract_strided_slice %17 {offsets = [0, 96], sizes = [8, 32], strides = [1, 1]} : vector<8x128xf32> to vector<8x32xf32>
    %23 = arith.mulf %20, %4 : vector<8x32xf32>
    %24 = arith.mulf %19, %21 : vector<8x32xf32>
    %25 = arith.addf %23, %24 : vector<8x32xf32>
    %26 = math.tanh %25 : vector<8x32xf32>
    %27 = arith.mulf %22, %26 : vector<8x32xf32>
    %28 = tpu.concatenate %27, %5 in 1 : vector<8x32xf32>, vector<8x32xf32> -> vector<8x64xf32>
    %29 = arith.truncf %28 : vector<8x64xf32> to vector<8x64xbf16>
    %c0_11 = arith.constant 0 : index
    %c0_12 = arith.constant 0 : index
    %30 = vector.load %arg3[%c0_11, %c0_12] : memref<64x128xbf16, #tpu.memory_space<vmem>>, vector<64x128xbf16>
    %cst_13 = arith.constant dense<0.000000e+00> : vector<8x128xf32>
    %31 = tpu.matmul %29, %30, %cst_13 {dimension_numbers = #tpu.dot_dimension_numbers<[1], [0], [0], [1], [0, 0, 1, 1], [], []>} : vector<8x64xbf16>, vector<64x128xbf16>, vector<8x128xf32> -> vector<8x128xf32>
    %32 = arith.addf %31, %2 : vector<8x128xf32>
    %33 = arith.negf %32 : vector<8x128xf32>
    %34 = math.exp %33 : vector<8x128xf32>
    %cst_14 = arith.constant 1.000000e+00 : f32
    %35 = vector.broadcast %cst_14 : f32 to vector<8x128xf32>
    %36 = arith.addf %35, %34 : vector<8x128xf32>
    %37 = arith.divf %35, %36 : vector<8x128xf32>
    %38 = math.tanh %32 : vector<8x128xf32>
    %39 = vector.extract_strided_slice %37 {offsets = [0, 0], sizes = [8, 32], strides = [1, 1]} : vector<8x128xf32> to vector<8x32xf32>
    %40 = vector.extract_strided_slice %37 {offsets = [0, 32], sizes = [8, 32], strides = [1, 1]} : vector<8x128xf32> to vector<8x32xf32>
    %41 = vector.extract_strided_slice %38 {offsets = [0, 64], sizes = [8, 32], strides = [1, 1]} : vector<8x128xf32> to vector<8x32xf32>
    %42 = vector.extract_strided_slice %37 {offsets = [0, 96], sizes = [8, 32], strides = [1, 1]} : vector<8x128xf32> to vector<8x32xf32>
    %43 = arith.mulf %40, %6 : vector<8x32xf32>
    %44 = arith.mulf %39, %41 : vector<8x32xf32>
    %45 = arith.addf %43, %44 : vector<8x32xf32>
    %46 = math.tanh %45 : vector<8x32xf32>
    %47 = arith.mulf %42, %46 : vector<8x32xf32>
    %c1 = arith.constant 1 : index
    %c0_15 = arith.constant 0 : index
    %c0_16 = arith.constant 0 : index
    %48 = vector.load %arg1[%c1, %c0_15, %c0_16] : memref<8x8x128xf32, #tpu.memory_space<vmem>>, vector<1x8x128xf32>
    %49 = vector.shape_cast %48 : vector<1x8x128xf32> to vector<8x128xf32>
    %50 = arith.truncf %27 : vector<8x32xf32> to vector<8x32xbf16>
    %c0_17 = arith.constant 0 : index
    %c0_18 = arith.constant 0 : index
    %51 = vector.load %arg2[%c0_17, %c0_18] : memref<32x128xbf16, #tpu.memory_space<vmem>>, vector<32x128xbf16>
    %cst_19 = arith.constant dense<0.000000e+00> : vector<8x128xf32>
    %52 = tpu.matmul %50, %51, %cst_19 {dimension_numbers = #tpu.dot_dimension_numbers<[1], [0], [0], [1], [0, 0, 1, 1], [], []>} : vector<8x32xbf16>, vector<32x128xbf16>, vector<8x128xf32> -> vector<8x128xf32>
    %53 = arith.addf %49, %52 : vector<8x128xf32>
    %54 = arith.negf %53 : vector<8x128xf32>
    %55 = math.exp %54 : vector<8x128xf32>
    %cst_20 = arith.constant 1.000000e+00 : f32
    %56 = vector.broadcast %cst_20 : f32 to vector<8x128xf32>
    %57 = arith.addf %56, %55 : vector<8x128xf32>
    %58 = arith.divf %56, %57 : vector<8x128xf32>
    %59 = math.tanh %53 : vector<8x128xf32>
    %60 = vector.extract_strided_slice %58 {offsets = [0, 0], sizes = [8, 32], strides = [1, 1]} : vector<8x128xf32> to vector<8x32xf32>
    %61 = vector.extract_strided_slice %58 {offsets = [0, 32], sizes = [8, 32], strides = [1, 1]} : vector<8x128xf32> to vector<8x32xf32>
    %62 = vector.extract_strided_slice %59 {offsets = [0, 64], sizes = [8, 32], strides = [1, 1]} : vector<8x128xf32> to vector<8x32xf32>
    %63 = vector.extract_strided_slice %58 {offsets = [0, 96], sizes = [8, 32], strides = [1, 1]} : vector<8x128xf32> to vector<8x32xf32>
    %64 = arith.mulf %61, %25 : vector<8x32xf32>
    %65 = arith.mulf %60, %62 : vector<8x32xf32>
    %66 = arith.addf %64, %65 : vector<8x32xf32>
    %67 = math.tanh %66 : vector<8x32xf32>
    %68 = arith.mulf %63, %67 : vector<8x32xf32>
    %69 = tpu.concatenate %68, %47 in 1 : vector<8x32xf32>, vector<8x32xf32> -> vector<8x64xf32>
    %70 = arith.truncf %69 : vector<8x64xf32> to vector<8x64xbf16>
    %c0_21 = arith.constant 0 : index
    %c0_22 = arith.constant 0 : index
    %71 = vector.load %arg3[%c0_21, %c0_22] : memref<64x128xbf16, #tpu.memory_space<vmem>>, vector<64x128xbf16>
    %cst_23 = arith.constant dense<0.000000e+00> : vector<8x128xf32>
    %72 = tpu.matmul %70, %71, %cst_23 {dimension_numbers = #tpu.dot_dimension_numbers<[1], [0], [0], [1], [0, 0, 1, 1], [], []>} : vector<8x64xbf16>, vector<64x128xbf16>, vector<8x128xf32> -> vector<8x128xf32>
    %73 = arith.addf %72, %2 : vector<8x128xf32>
    %74 = arith.negf %73 : vector<8x128xf32>
    %75 = math.exp %74 : vector<8x128xf32>
    %cst_24 = arith.constant 1.000000e+00 : f32
    %76 = vector.broadcast %cst_24 : f32 to vector<8x128xf32>
    %77 = arith.addf %76, %75 : vector<8x128xf32>
    %78 = arith.divf %76, %77 : vector<8x128xf32>
    %79 = math.tanh %73 : vector<8x128xf32>
    %80 = vector.extract_strided_slice %78 {offsets = [0, 0], sizes = [8, 32], strides = [1, 1]} : vector<8x128xf32> to vector<8x32xf32>
    %81 = vector.extract_strided_slice %78 {offsets = [0, 32], sizes = [8, 32], strides = [1, 1]} : vector<8x128xf32> to vector<8x32xf32>
    %82 = vector.extract_strided_slice %79 {offsets = [0, 64], sizes = [8, 32], strides = [1, 1]} : vector<8x128xf32> to vector<8x32xf32>
    %83 = vector.extract_strided_slice %78 {offsets = [0, 96], sizes = [8, 32], strides = [1, 1]} : vector<8x128xf32> to vector<8x32xf32>
    %84 = arith.mulf %81, %45 : vector<8x32xf32>
    %85 = arith.mulf %80, %82 : vector<8x32xf32>
    %86 = arith.addf %84, %85 : vector<8x32xf32>
    %87 = math.tanh %86 : vector<8x32xf32>
    %88 = arith.mulf %83, %87 : vector<8x32xf32>
    %c2 = arith.constant 2 : index
    %c0_25 = arith.constant 0 : index
    %c0_26 = arith.constant 0 : index
    %89 = vector.load %arg1[%c2, %c0_25, %c0_26] : memref<8x8x128xf32, #tpu.memory_space<vmem>>, vector<1x8x128xf32>
    %90 = vector.shape_cast %89 : vector<1x8x128xf32> to vector<8x128xf32>
    %91 = arith.truncf %68 : vector<8x32xf32> to vector<8x32xbf16>
    %c0_27 = arith.constant 0 : index
    %c0_28 = arith.constant 0 : index
    %92 = vector.load %arg2[%c0_27, %c0_28] : memref<32x128xbf16, #tpu.memory_space<vmem>>, vector<32x128xbf16>
    %cst_29 = arith.constant dense<0.000000e+00> : vector<8x128xf32>
    %93 = tpu.matmul %91, %92, %cst_29 {dimension_numbers = #tpu.dot_dimension_numbers<[1], [0], [0], [1], [0, 0, 1, 1], [], []>} : vector<8x32xbf16>, vector<32x128xbf16>, vector<8x128xf32> -> vector<8x128xf32>
    %94 = arith.addf %90, %93 : vector<8x128xf32>
    %95 = arith.negf %94 : vector<8x128xf32>
    %96 = math.exp %95 : vector<8x128xf32>
    %cst_30 = arith.constant 1.000000e+00 : f32
    %97 = vector.broadcast %cst_30 : f32 to vector<8x128xf32>
    %98 = arith.addf %97, %96 : vector<8x128xf32>
    %99 = arith.divf %97, %98 : vector<8x128xf32>
    %100 = math.tanh %94 : vector<8x128xf32>
    %101 = vector.extract_strided_slice %99 {offsets = [0, 0], sizes = [8, 32], strides = [1, 1]} : vector<8x128xf32> to vector<8x32xf32>
    %102 = vector.extract_strided_slice %99 {offsets = [0, 32], sizes = [8, 32], strides = [1, 1]} : vector<8x128xf32> to vector<8x32xf32>
    %103 = vector.extract_strided_slice %100 {offsets = [0, 64], sizes = [8, 32], strides = [1, 1]} : vector<8x128xf32> to vector<8x32xf32>
    %104 = vector.extract_strided_slice %99 {offsets = [0, 96], sizes = [8, 32], strides = [1, 1]} : vector<8x128xf32> to vector<8x32xf32>
    %105 = arith.mulf %102, %66 : vector<8x32xf32>
    %106 = arith.mulf %101, %103 : vector<8x32xf32>
    %107 = arith.addf %105, %106 : vector<8x32xf32>
    %108 = math.tanh %107 : vector<8x32xf32>
    %109 = arith.mulf %104, %108 : vector<8x32xf32>
    %110 = tpu.concatenate %109, %88 in 1 : vector<8x32xf32>, vector<8x32xf32> -> vector<8x64xf32>
    %111 = arith.truncf %110 : vector<8x64xf32> to vector<8x64xbf16>
    %c0_31 = arith.constant 0 : index
    %c0_32 = arith.constant 0 : index
    %112 = vector.load %arg3[%c0_31, %c0_32] : memref<64x128xbf16, #tpu.memory_space<vmem>>, vector<64x128xbf16>
    %cst_33 = arith.constant dense<0.000000e+00> : vector<8x128xf32>
    %113 = tpu.matmul %111, %112, %cst_33 {dimension_numbers = #tpu.dot_dimension_numbers<[1], [0], [0], [1], [0, 0, 1, 1], [], []>} : vector<8x64xbf16>, vector<64x128xbf16>, vector<8x128xf32> -> vector<8x128xf32>
    %114 = arith.addf %113, %2 : vector<8x128xf32>
    %115 = arith.negf %114 : vector<8x128xf32>
    %116 = math.exp %115 : vector<8x128xf32>
    %cst_34 = arith.constant 1.000000e+00 : f32
    %117 = vector.broadcast %cst_34 : f32 to vector<8x128xf32>
    %118 = arith.addf %117, %116 : vector<8x128xf32>
    %119 = arith.divf %117, %118 : vector<8x128xf32>
    %120 = math.tanh %114 : vector<8x128xf32>
    %121 = vector.extract_strided_slice %119 {offsets = [0, 0], sizes = [8, 32], strides = [1, 1]} : vector<8x128xf32> to vector<8x32xf32>
    %122 = vector.extract_strided_slice %119 {offsets = [0, 32], sizes = [8, 32], strides = [1, 1]} : vector<8x128xf32> to vector<8x32xf32>
    %123 = vector.extract_strided_slice %120 {offsets = [0, 64], sizes = [8, 32], strides = [1, 1]} : vector<8x128xf32> to vector<8x32xf32>
    %124 = vector.extract_strided_slice %119 {offsets = [0, 96], sizes = [8, 32], strides = [1, 1]} : vector<8x128xf32> to vector<8x32xf32>
    %125 = arith.mulf %122, %86 : vector<8x32xf32>
    %126 = arith.mulf %121, %123 : vector<8x32xf32>
    %127 = arith.addf %125, %126 : vector<8x32xf32>
    %128 = math.tanh %127 : vector<8x32xf32>
    %129 = arith.mulf %124, %128 : vector<8x32xf32>
    %c3 = arith.constant 3 : index
    %c0_35 = arith.constant 0 : index
    %c0_36 = arith.constant 0 : index
    %130 = vector.load %arg1[%c3, %c0_35, %c0_36] : memref<8x8x128xf32, #tpu.memory_space<vmem>>, vector<1x8x128xf32>
    %131 = vector.shape_cast %130 : vector<1x8x128xf32> to vector<8x128xf32>
    %132 = arith.truncf %109 : vector<8x32xf32> to vector<8x32xbf16>
    %c0_37 = arith.constant 0 : index
    %c0_38 = arith.constant 0 : index
    %133 = vector.load %arg2[%c0_37, %c0_38] : memref<32x128xbf16, #tpu.memory_space<vmem>>, vector<32x128xbf16>
    %cst_39 = arith.constant dense<0.000000e+00> : vector<8x128xf32>
    %134 = tpu.matmul %132, %133, %cst_39 {dimension_numbers = #tpu.dot_dimension_numbers<[1], [0], [0], [1], [0, 0, 1, 1], [], []>} : vector<8x32xbf16>, vector<32x128xbf16>, vector<8x128xf32> -> vector<8x128xf32>
    %135 = arith.addf %131, %134 : vector<8x128xf32>
    %136 = arith.negf %135 : vector<8x128xf32>
    %137 = math.exp %136 : vector<8x128xf32>
    %cst_40 = arith.constant 1.000000e+00 : f32
    %138 = vector.broadcast %cst_40 : f32 to vector<8x128xf32>
    %139 = arith.addf %138, %137 : vector<8x128xf32>
    %140 = arith.divf %138, %139 : vector<8x128xf32>
    %141 = math.tanh %135 : vector<8x128xf32>
    %142 = vector.extract_strided_slice %140 {offsets = [0, 0], sizes = [8, 32], strides = [1, 1]} : vector<8x128xf32> to vector<8x32xf32>
    %143 = vector.extract_strided_slice %140 {offsets = [0, 32], sizes = [8, 32], strides = [1, 1]} : vector<8x128xf32> to vector<8x32xf32>
    %144 = vector.extract_strided_slice %141 {offsets = [0, 64], sizes = [8, 32], strides = [1, 1]} : vector<8x128xf32> to vector<8x32xf32>
    %145 = vector.extract_strided_slice %140 {offsets = [0, 96], sizes = [8, 32], strides = [1, 1]} : vector<8x128xf32> to vector<8x32xf32>
    %146 = arith.mulf %143, %107 : vector<8x32xf32>
    %147 = arith.mulf %142, %144 : vector<8x32xf32>
    %148 = arith.addf %146, %147 : vector<8x32xf32>
    %149 = math.tanh %148 : vector<8x32xf32>
    %150 = arith.mulf %145, %149 : vector<8x32xf32>
    %151 = tpu.concatenate %150, %129 in 1 : vector<8x32xf32>, vector<8x32xf32> -> vector<8x64xf32>
    %152 = arith.truncf %151 : vector<8x64xf32> to vector<8x64xbf16>
    %c0_41 = arith.constant 0 : index
    %c0_42 = arith.constant 0 : index
    %153 = vector.load %arg3[%c0_41, %c0_42] : memref<64x128xbf16, #tpu.memory_space<vmem>>, vector<64x128xbf16>
    %cst_43 = arith.constant dense<0.000000e+00> : vector<8x128xf32>
    %154 = tpu.matmul %152, %153, %cst_43 {dimension_numbers = #tpu.dot_dimension_numbers<[1], [0], [0], [1], [0, 0, 1, 1], [], []>} : vector<8x64xbf16>, vector<64x128xbf16>, vector<8x128xf32> -> vector<8x128xf32>
    %155 = arith.addf %154, %2 : vector<8x128xf32>
    %156 = arith.negf %155 : vector<8x128xf32>
    %157 = math.exp %156 : vector<8x128xf32>
    %cst_44 = arith.constant 1.000000e+00 : f32
    %158 = vector.broadcast %cst_44 : f32 to vector<8x128xf32>
    %159 = arith.addf %158, %157 : vector<8x128xf32>
    %160 = arith.divf %158, %159 : vector<8x128xf32>
    %161 = math.tanh %155 : vector<8x128xf32>
    %162 = vector.extract_strided_slice %160 {offsets = [0, 0], sizes = [8, 32], strides = [1, 1]} : vector<8x128xf32> to vector<8x32xf32>
    %163 = vector.extract_strided_slice %160 {offsets = [0, 32], sizes = [8, 32], strides = [1, 1]} : vector<8x128xf32> to vector<8x32xf32>
    %164 = vector.extract_strided_slice %161 {offsets = [0, 64], sizes = [8, 32], strides = [1, 1]} : vector<8x128xf32> to vector<8x32xf32>
    %165 = vector.extract_strided_slice %160 {offsets = [0, 96], sizes = [8, 32], strides = [1, 1]} : vector<8x128xf32> to vector<8x32xf32>
    %166 = arith.mulf %163, %127 : vector<8x32xf32>
    %167 = arith.mulf %162, %164 : vector<8x32xf32>
    %168 = arith.addf %166, %167 : vector<8x32xf32>
    %169 = math.tanh %168 : vector<8x32xf32>
    %170 = arith.mulf %165, %169 : vector<8x32xf32>
    %c4 = arith.constant 4 : index
    %c0_45 = arith.constant 0 : index
    %c0_46 = arith.constant 0 : index
    %171 = vector.load %arg1[%c4, %c0_45, %c0_46] : memref<8x8x128xf32, #tpu.memory_space<vmem>>, vector<1x8x128xf32>
    %172 = vector.shape_cast %171 : vector<1x8x128xf32> to vector<8x128xf32>
    %173 = arith.truncf %150 : vector<8x32xf32> to vector<8x32xbf16>
    %c0_47 = arith.constant 0 : index
    %c0_48 = arith.constant 0 : index
    %174 = vector.load %arg2[%c0_47, %c0_48] : memref<32x128xbf16, #tpu.memory_space<vmem>>, vector<32x128xbf16>
    %cst_49 = arith.constant dense<0.000000e+00> : vector<8x128xf32>
    %175 = tpu.matmul %173, %174, %cst_49 {dimension_numbers = #tpu.dot_dimension_numbers<[1], [0], [0], [1], [0, 0, 1, 1], [], []>} : vector<8x32xbf16>, vector<32x128xbf16>, vector<8x128xf32> -> vector<8x128xf32>
    %176 = arith.addf %172, %175 : vector<8x128xf32>
    %177 = arith.negf %176 : vector<8x128xf32>
    %178 = math.exp %177 : vector<8x128xf32>
    %cst_50 = arith.constant 1.000000e+00 : f32
    %179 = vector.broadcast %cst_50 : f32 to vector<8x128xf32>
    %180 = arith.addf %179, %178 : vector<8x128xf32>
    %181 = arith.divf %179, %180 : vector<8x128xf32>
    %182 = math.tanh %176 : vector<8x128xf32>
    %183 = vector.extract_strided_slice %181 {offsets = [0, 0], sizes = [8, 32], strides = [1, 1]} : vector<8x128xf32> to vector<8x32xf32>
    %184 = vector.extract_strided_slice %181 {offsets = [0, 32], sizes = [8, 32], strides = [1, 1]} : vector<8x128xf32> to vector<8x32xf32>
    %185 = vector.extract_strided_slice %182 {offsets = [0, 64], sizes = [8, 32], strides = [1, 1]} : vector<8x128xf32> to vector<8x32xf32>
    %186 = vector.extract_strided_slice %181 {offsets = [0, 96], sizes = [8, 32], strides = [1, 1]} : vector<8x128xf32> to vector<8x32xf32>
    %187 = arith.mulf %184, %148 : vector<8x32xf32>
    %188 = arith.mulf %183, %185 : vector<8x32xf32>
    %189 = arith.addf %187, %188 : vector<8x32xf32>
    %190 = math.tanh %189 : vector<8x32xf32>
    %191 = arith.mulf %186, %190 : vector<8x32xf32>
    %192 = tpu.concatenate %191, %170 in 1 : vector<8x32xf32>, vector<8x32xf32> -> vector<8x64xf32>
    %193 = arith.truncf %192 : vector<8x64xf32> to vector<8x64xbf16>
    %c0_51 = arith.constant 0 : index
    %c0_52 = arith.constant 0 : index
    %194 = vector.load %arg3[%c0_51, %c0_52] : memref<64x128xbf16, #tpu.memory_space<vmem>>, vector<64x128xbf16>
    %cst_53 = arith.constant dense<0.000000e+00> : vector<8x128xf32>
    %195 = tpu.matmul %193, %194, %cst_53 {dimension_numbers = #tpu.dot_dimension_numbers<[1], [0], [0], [1], [0, 0, 1, 1], [], []>} : vector<8x64xbf16>, vector<64x128xbf16>, vector<8x128xf32> -> vector<8x128xf32>
    %196 = arith.addf %195, %2 : vector<8x128xf32>
    %197 = arith.negf %196 : vector<8x128xf32>
    %198 = math.exp %197 : vector<8x128xf32>
    %cst_54 = arith.constant 1.000000e+00 : f32
    %199 = vector.broadcast %cst_54 : f32 to vector<8x128xf32>
    %200 = arith.addf %199, %198 : vector<8x128xf32>
    %201 = arith.divf %199, %200 : vector<8x128xf32>
    %202 = math.tanh %196 : vector<8x128xf32>
    %203 = vector.extract_strided_slice %201 {offsets = [0, 0], sizes = [8, 32], strides = [1, 1]} : vector<8x128xf32> to vector<8x32xf32>
    %204 = vector.extract_strided_slice %201 {offsets = [0, 32], sizes = [8, 32], strides = [1, 1]} : vector<8x128xf32> to vector<8x32xf32>
    %205 = vector.extract_strided_slice %202 {offsets = [0, 64], sizes = [8, 32], strides = [1, 1]} : vector<8x128xf32> to vector<8x32xf32>
    %206 = vector.extract_strided_slice %201 {offsets = [0, 96], sizes = [8, 32], strides = [1, 1]} : vector<8x128xf32> to vector<8x32xf32>
    %207 = arith.mulf %204, %168 : vector<8x32xf32>
    %208 = arith.mulf %203, %205 : vector<8x32xf32>
    %209 = arith.addf %207, %208 : vector<8x32xf32>
    %210 = math.tanh %209 : vector<8x32xf32>
    %211 = arith.mulf %206, %210 : vector<8x32xf32>
    %c5 = arith.constant 5 : index
    %c0_55 = arith.constant 0 : index
    %c0_56 = arith.constant 0 : index
    %212 = vector.load %arg1[%c5, %c0_55, %c0_56] : memref<8x8x128xf32, #tpu.memory_space<vmem>>, vector<1x8x128xf32>
    %213 = vector.shape_cast %212 : vector<1x8x128xf32> to vector<8x128xf32>
    %214 = arith.truncf %191 : vector<8x32xf32> to vector<8x32xbf16>
    %c0_57 = arith.constant 0 : index
    %c0_58 = arith.constant 0 : index
    %215 = vector.load %arg2[%c0_57, %c0_58] : memref<32x128xbf16, #tpu.memory_space<vmem>>, vector<32x128xbf16>
    %cst_59 = arith.constant dense<0.000000e+00> : vector<8x128xf32>
    %216 = tpu.matmul %214, %215, %cst_59 {dimension_numbers = #tpu.dot_dimension_numbers<[1], [0], [0], [1], [0, 0, 1, 1], [], []>} : vector<8x32xbf16>, vector<32x128xbf16>, vector<8x128xf32> -> vector<8x128xf32>
    %217 = arith.addf %213, %216 : vector<8x128xf32>
    %218 = arith.negf %217 : vector<8x128xf32>
    %219 = math.exp %218 : vector<8x128xf32>
    %cst_60 = arith.constant 1.000000e+00 : f32
    %220 = vector.broadcast %cst_60 : f32 to vector<8x128xf32>
    %221 = arith.addf %220, %219 : vector<8x128xf32>
    %222 = arith.divf %220, %221 : vector<8x128xf32>
    %223 = math.tanh %217 : vector<8x128xf32>
    %224 = vector.extract_strided_slice %222 {offsets = [0, 0], sizes = [8, 32], strides = [1, 1]} : vector<8x128xf32> to vector<8x32xf32>
    %225 = vector.extract_strided_slice %222 {offsets = [0, 32], sizes = [8, 32], strides = [1, 1]} : vector<8x128xf32> to vector<8x32xf32>
    %226 = vector.extract_strided_slice %223 {offsets = [0, 64], sizes = [8, 32], strides = [1, 1]} : vector<8x128xf32> to vector<8x32xf32>
    %227 = vector.extract_strided_slice %222 {offsets = [0, 96], sizes = [8, 32], strides = [1, 1]} : vector<8x128xf32> to vector<8x32xf32>
    %228 = arith.mulf %225, %189 : vector<8x32xf32>
    %229 = arith.mulf %224, %226 : vector<8x32xf32>
    %230 = arith.addf %228, %229 : vector<8x32xf32>
    %231 = math.tanh %230 : vector<8x32xf32>
    %232 = arith.mulf %227, %231 : vector<8x32xf32>
    %233 = tpu.concatenate %232, %211 in 1 : vector<8x32xf32>, vector<8x32xf32> -> vector<8x64xf32>
    %234 = arith.truncf %233 : vector<8x64xf32> to vector<8x64xbf16>
    %c0_61 = arith.constant 0 : index
    %c0_62 = arith.constant 0 : index
    %235 = vector.load %arg3[%c0_61, %c0_62] : memref<64x128xbf16, #tpu.memory_space<vmem>>, vector<64x128xbf16>
    %cst_63 = arith.constant dense<0.000000e+00> : vector<8x128xf32>
    %236 = tpu.matmul %234, %235, %cst_63 {dimension_numbers = #tpu.dot_dimension_numbers<[1], [0], [0], [1], [0, 0, 1, 1], [], []>} : vector<8x64xbf16>, vector<64x128xbf16>, vector<8x128xf32> -> vector<8x128xf32>
    %237 = arith.addf %236, %2 : vector<8x128xf32>
    %238 = arith.negf %237 : vector<8x128xf32>
    %239 = math.exp %238 : vector<8x128xf32>
    %cst_64 = arith.constant 1.000000e+00 : f32
    %240 = vector.broadcast %cst_64 : f32 to vector<8x128xf32>
    %241 = arith.addf %240, %239 : vector<8x128xf32>
    %242 = arith.divf %240, %241 : vector<8x128xf32>
    %243 = math.tanh %237 : vector<8x128xf32>
    %244 = vector.extract_strided_slice %242 {offsets = [0, 0], sizes = [8, 32], strides = [1, 1]} : vector<8x128xf32> to vector<8x32xf32>
    %245 = vector.extract_strided_slice %242 {offsets = [0, 32], sizes = [8, 32], strides = [1, 1]} : vector<8x128xf32> to vector<8x32xf32>
    %246 = vector.extract_strided_slice %243 {offsets = [0, 64], sizes = [8, 32], strides = [1, 1]} : vector<8x128xf32> to vector<8x32xf32>
    %247 = vector.extract_strided_slice %242 {offsets = [0, 96], sizes = [8, 32], strides = [1, 1]} : vector<8x128xf32> to vector<8x32xf32>
    %248 = arith.mulf %245, %209 : vector<8x32xf32>
    %249 = arith.mulf %244, %246 : vector<8x32xf32>
    %250 = arith.addf %248, %249 : vector<8x32xf32>
    %251 = math.tanh %250 : vector<8x32xf32>
    %252 = arith.mulf %247, %251 : vector<8x32xf32>
    %c6 = arith.constant 6 : index
    %c0_65 = arith.constant 0 : index
    %c0_66 = arith.constant 0 : index
    %253 = vector.load %arg1[%c6, %c0_65, %c0_66] : memref<8x8x128xf32, #tpu.memory_space<vmem>>, vector<1x8x128xf32>
    %254 = vector.shape_cast %253 : vector<1x8x128xf32> to vector<8x128xf32>
    %255 = arith.truncf %232 : vector<8x32xf32> to vector<8x32xbf16>
    %c0_67 = arith.constant 0 : index
    %c0_68 = arith.constant 0 : index
    %256 = vector.load %arg2[%c0_67, %c0_68] : memref<32x128xbf16, #tpu.memory_space<vmem>>, vector<32x128xbf16>
    %cst_69 = arith.constant dense<0.000000e+00> : vector<8x128xf32>
    %257 = tpu.matmul %255, %256, %cst_69 {dimension_numbers = #tpu.dot_dimension_numbers<[1], [0], [0], [1], [0, 0, 1, 1], [], []>} : vector<8x32xbf16>, vector<32x128xbf16>, vector<8x128xf32> -> vector<8x128xf32>
    %258 = arith.addf %254, %257 : vector<8x128xf32>
    %259 = arith.negf %258 : vector<8x128xf32>
    %260 = math.exp %259 : vector<8x128xf32>
    %cst_70 = arith.constant 1.000000e+00 : f32
    %261 = vector.broadcast %cst_70 : f32 to vector<8x128xf32>
    %262 = arith.addf %261, %260 : vector<8x128xf32>
    %263 = arith.divf %261, %262 : vector<8x128xf32>
    %264 = math.tanh %258 : vector<8x128xf32>
    %265 = vector.extract_strided_slice %263 {offsets = [0, 0], sizes = [8, 32], strides = [1, 1]} : vector<8x128xf32> to vector<8x32xf32>
    %266 = vector.extract_strided_slice %263 {offsets = [0, 32], sizes = [8, 32], strides = [1, 1]} : vector<8x128xf32> to vector<8x32xf32>
    %267 = vector.extract_strided_slice %264 {offsets = [0, 64], sizes = [8, 32], strides = [1, 1]} : vector<8x128xf32> to vector<8x32xf32>
    %268 = vector.extract_strided_slice %263 {offsets = [0, 96], sizes = [8, 32], strides = [1, 1]} : vector<8x128xf32> to vector<8x32xf32>
    %269 = arith.mulf %266, %230 : vector<8x32xf32>
    %270 = arith.mulf %265, %267 : vector<8x32xf32>
    %271 = arith.addf %269, %270 : vector<8x32xf32>
    %272 = math.tanh %271 : vector<8x32xf32>
    %273 = arith.mulf %268, %272 : vector<8x32xf32>
    %274 = tpu.concatenate %273, %252 in 1 : vector<8x32xf32>, vector<8x32xf32> -> vector<8x64xf32>
    %275 = arith.truncf %274 : vector<8x64xf32> to vector<8x64xbf16>
    %c0_71 = arith.constant 0 : index
    %c0_72 = arith.constant 0 : index
    %276 = vector.load %arg3[%c0_71, %c0_72] : memref<64x128xbf16, #tpu.memory_space<vmem>>, vector<64x128xbf16>
    %cst_73 = arith.constant dense<0.000000e+00> : vector<8x128xf32>
    %277 = tpu.matmul %275, %276, %cst_73 {dimension_numbers = #tpu.dot_dimension_numbers<[1], [0], [0], [1], [0, 0, 1, 1], [], []>} : vector<8x64xbf16>, vector<64x128xbf16>, vector<8x128xf32> -> vector<8x128xf32>
    %278 = arith.addf %277, %2 : vector<8x128xf32>
    %279 = arith.negf %278 : vector<8x128xf32>
    %280 = math.exp %279 : vector<8x128xf32>
    %cst_74 = arith.constant 1.000000e+00 : f32
    %281 = vector.broadcast %cst_74 : f32 to vector<8x128xf32>
    %282 = arith.addf %281, %280 : vector<8x128xf32>
    %283 = arith.divf %281, %282 : vector<8x128xf32>
    %284 = math.tanh %278 : vector<8x128xf32>
    %285 = vector.extract_strided_slice %283 {offsets = [0, 0], sizes = [8, 32], strides = [1, 1]} : vector<8x128xf32> to vector<8x32xf32>
    %286 = vector.extract_strided_slice %283 {offsets = [0, 32], sizes = [8, 32], strides = [1, 1]} : vector<8x128xf32> to vector<8x32xf32>
    %287 = vector.extract_strided_slice %284 {offsets = [0, 64], sizes = [8, 32], strides = [1, 1]} : vector<8x128xf32> to vector<8x32xf32>
    %288 = vector.extract_strided_slice %283 {offsets = [0, 96], sizes = [8, 32], strides = [1, 1]} : vector<8x128xf32> to vector<8x32xf32>
    %289 = arith.mulf %286, %250 : vector<8x32xf32>
    %290 = arith.mulf %285, %287 : vector<8x32xf32>
    %291 = arith.addf %289, %290 : vector<8x32xf32>
    %292 = math.tanh %291 : vector<8x32xf32>
    %293 = arith.mulf %288, %292 : vector<8x32xf32>
    %c7 = arith.constant 7 : index
    %c0_75 = arith.constant 0 : index
    %c0_76 = arith.constant 0 : index
    %294 = vector.load %arg1[%c7, %c0_75, %c0_76] : memref<8x8x128xf32, #tpu.memory_space<vmem>>, vector<1x8x128xf32>
    %295 = vector.shape_cast %294 : vector<1x8x128xf32> to vector<8x128xf32>
    %296 = arith.truncf %273 : vector<8x32xf32> to vector<8x32xbf16>
    %c0_77 = arith.constant 0 : index
    %c0_78 = arith.constant 0 : index
    %297 = vector.load %arg2[%c0_77, %c0_78] : memref<32x128xbf16, #tpu.memory_space<vmem>>, vector<32x128xbf16>
    %cst_79 = arith.constant dense<0.000000e+00> : vector<8x128xf32>
    %298 = tpu.matmul %296, %297, %cst_79 {dimension_numbers = #tpu.dot_dimension_numbers<[1], [0], [0], [1], [0, 0, 1, 1], [], []>} : vector<8x32xbf16>, vector<32x128xbf16>, vector<8x128xf32> -> vector<8x128xf32>
    %299 = arith.addf %295, %298 : vector<8x128xf32>
    %300 = arith.negf %299 : vector<8x128xf32>
    %301 = math.exp %300 : vector<8x128xf32>
    %cst_80 = arith.constant 1.000000e+00 : f32
    %302 = vector.broadcast %cst_80 : f32 to vector<8x128xf32>
    %303 = arith.addf %302, %301 : vector<8x128xf32>
    %304 = arith.divf %302, %303 : vector<8x128xf32>
    %305 = math.tanh %299 : vector<8x128xf32>
    %306 = vector.extract_strided_slice %304 {offsets = [0, 0], sizes = [8, 32], strides = [1, 1]} : vector<8x128xf32> to vector<8x32xf32>
    %307 = vector.extract_strided_slice %304 {offsets = [0, 32], sizes = [8, 32], strides = [1, 1]} : vector<8x128xf32> to vector<8x32xf32>
    %308 = vector.extract_strided_slice %305 {offsets = [0, 64], sizes = [8, 32], strides = [1, 1]} : vector<8x128xf32> to vector<8x32xf32>
    %309 = vector.extract_strided_slice %304 {offsets = [0, 96], sizes = [8, 32], strides = [1, 1]} : vector<8x128xf32> to vector<8x32xf32>
    %310 = arith.mulf %307, %271 : vector<8x32xf32>
    %311 = arith.mulf %306, %308 : vector<8x32xf32>
    %312 = arith.addf %310, %311 : vector<8x32xf32>
    %313 = math.tanh %312 : vector<8x32xf32>
    %314 = arith.mulf %309, %313 : vector<8x32xf32>
    %315 = tpu.concatenate %314, %293 in 1 : vector<8x32xf32>, vector<8x32xf32> -> vector<8x64xf32>
    %316 = arith.truncf %315 : vector<8x64xf32> to vector<8x64xbf16>
    %c0_81 = arith.constant 0 : index
    %c0_82 = arith.constant 0 : index
    %317 = vector.load %arg3[%c0_81, %c0_82] : memref<64x128xbf16, #tpu.memory_space<vmem>>, vector<64x128xbf16>
    %cst_83 = arith.constant dense<0.000000e+00> : vector<8x128xf32>
    %318 = tpu.matmul %316, %317, %cst_83 {dimension_numbers = #tpu.dot_dimension_numbers<[1], [0], [0], [1], [0, 0, 1, 1], [], []>} : vector<8x64xbf16>, vector<64x128xbf16>, vector<8x128xf32> -> vector<8x128xf32>
    %319 = arith.addf %318, %2 : vector<8x128xf32>
    %320 = arith.negf %319 : vector<8x128xf32>
    %321 = math.exp %320 : vector<8x128xf32>
    %cst_84 = arith.constant 1.000000e+00 : f32
    %322 = vector.broadcast %cst_84 : f32 to vector<8x128xf32>
    %323 = arith.addf %322, %321 : vector<8x128xf32>
    %324 = arith.divf %322, %323 : vector<8x128xf32>
    %325 = math.tanh %319 : vector<8x128xf32>
    %326 = vector.extract_strided_slice %324 {offsets = [0, 0], sizes = [8, 32], strides = [1, 1]} : vector<8x128xf32> to vector<8x32xf32>
    %327 = vector.extract_strided_slice %324 {offsets = [0, 32], sizes = [8, 32], strides = [1, 1]} : vector<8x128xf32> to vector<8x32xf32>
    %328 = vector.extract_strided_slice %325 {offsets = [0, 64], sizes = [8, 32], strides = [1, 1]} : vector<8x128xf32> to vector<8x32xf32>
    %329 = vector.extract_strided_slice %324 {offsets = [0, 96], sizes = [8, 32], strides = [1, 1]} : vector<8x128xf32> to vector<8x32xf32>
    %330 = arith.mulf %327, %291 : vector<8x32xf32>
    %331 = arith.mulf %326, %328 : vector<8x32xf32>
    %332 = arith.addf %330, %331 : vector<8x32xf32>
    %333 = math.tanh %332 : vector<8x32xf32>
    %334 = arith.mulf %329, %333 : vector<8x32xf32>
    %cst_85 = arith.constant dense<0.000000e+00> : vector<8xf32>
    %335 = vector.multi_reduction <add>, %334, %cst_85 [1] : vector<8x32xf32> to vector<8xf32>
    %336 = vector.shape_cast %335 : vector<8xf32> to vector<8x1xf32>
    %cst_86 = arith.constant 3.200000e+01 : f32
    %337 = vector.broadcast %cst_86 : f32 to vector<8x1xf32>
    %338 = arith.divf %336, %337 : vector<8x1xf32>
    %339 = vector.broadcast %338 : vector<8x1xf32> to vector<8x32xf32>
    %340 = arith.subf %334, %339 : vector<8x32xf32>
    %341 = arith.mulf %340, %340 : vector<8x32xf32>
    %cst_87 = arith.constant dense<0.000000e+00> : vector<8xf32>
    %342 = vector.multi_reduction <add>, %341, %cst_87 [1] : vector<8x32xf32> to vector<8xf32>
    %343 = vector.shape_cast %342 : vector<8xf32> to vector<8x1xf32>
    %cst_88 = arith.constant 3.200000e+01 : f32
    %344 = vector.broadcast %cst_88 : f32 to vector<8x1xf32>
    %345 = arith.divf %343, %344 : vector<8x1xf32>
    %cst_89 = arith.constant 9.99999974E-6 : f32
    %346 = vector.broadcast %cst_89 : f32 to vector<8x1xf32>
    %347 = arith.addf %345, %346 : vector<8x1xf32>
    %348 = math.rsqrt %347 : vector<8x1xf32>
    %349 = vector.broadcast %348 : vector<8x1xf32> to vector<8x32xf32>
    %350 = arith.mulf %340, %349 : vector<8x32xf32>
    %c0_90 = arith.constant 0 : index
    %c0_91 = arith.constant 0 : index
    %351 = vector.load %arg5[%c0_90, %c0_91] : memref<1x32xf32, #tpu.memory_space<vmem>>, vector<1x32xf32>
    %352 = vector.broadcast %351 : vector<1x32xf32> to vector<8x32xf32>
    %353 = arith.mulf %350, %352 : vector<8x32xf32>
    %c0_92 = arith.constant 0 : index
    %c0_93 = arith.constant 0 : index
    %354 = vector.load %arg6[%c0_92, %c0_93] : memref<1x32xf32, #tpu.memory_space<vmem>>, vector<1x32xf32>
    %355 = vector.broadcast %354 : vector<1x32xf32> to vector<8x32xf32>
    %356 = arith.addf %353, %355 : vector<8x32xf32>
    %cst_94 = arith.constant 0.000000e+00 : f32
    %357 = vector.broadcast %cst_94 : f32 to vector<8x96xf32>
    %358 = tpu.concatenate %356, %357 in 1 : vector<8x32xf32>, vector<8x96xf32> -> vector<8x128xf32>
    %c0_95 = arith.constant 0 : index
    %c0_96 = arith.constant 0 : index
    %359 = vector.load %arg7[%c0_95, %c0_96] : memref<8x128xf32, #tpu.memory_space<vmem>>, vector<8x128xf32>
    tpu.vector_store %arg7[%c0_95, %c0_96], %358 {strides = array<i32>} : memref<8x128xf32, #tpu.memory_space<vmem>>, vector<8x128xf32>,
    return
  }
  func.func @transform_0(%arg0: i32) -> (i32, i32, i32) {
    %c0_i32 = arith.constant 0 : i32
    %c0_i32_0 = arith.constant 0 : i32
    %c0_i32_1 = arith.constant 0 : i32
    return %c0_i32, %arg0, %c0_i32_0 : i32, i32, i32
  }
  func.func @transform_1(%arg0: i32) -> (i32, i32) {
    %c0_i32 = arith.constant 0 : i32
    %c0_i32_0 = arith.constant 0 : i32
    %c0_i32_1 = arith.constant 0 : i32
    return %c0_i32, %c0_i32_0 : i32, i32
  }
  func.func @transform_2(%arg0: i32) -> (i32, i32) {
    %c0_i32 = arith.constant 0 : i32
    %c0_i32_0 = arith.constant 0 : i32
    %c0_i32_1 = arith.constant 0 : i32
    return %c0_i32, %c0_i32_0 : i32, i32
  }
  func.func @transform_3(%arg0: i32) -> (i32, i32) {
    %c0_i32 = arith.constant 0 : i32
    %c0_i32_0 = arith.constant 0 : i32
    %c0_i32_1 = arith.constant 0 : i32
    return %c0_i32, %c0_i32_0 : i32, i32
  }
  func.func @transform_4(%arg0: i32) -> (i32, i32) {
    %c0_i32 = arith.constant 0 : i32
    %c0_i32_0 = arith.constant 0 : i32
    %c0_i32_1 = arith.constant 0 : i32
    return %c0_i32, %c0_i32_0 : i32, i32
  }
  func.func @transform_5(%arg0: i32) -> (i32, i32) {
    %c0_i32 = arith.constant 0 : i32
    %c0_i32_0 = arith.constant 0 : i32
    %c0_i32_1 = arith.constant 0 : i32
    return %c0_i32, %c0_i32_0 : i32, i32
  }
  func.func @transform_6(%arg0: i32) -> (i32, i32) {
    %c0_i32 = arith.constant 0 : i32
    %c0_i32_0 = arith.constant 0 : i32
    return %arg0, %c0_i32 : i32, i32
  }
}

</mosaic_0001>

<bundles_post_ra>
// kernel: tpu_custom_call.1
= control target key start
LH: loop header
LB: loop body
LE: loop exit
PB: predicated region body
PF: predicated region fallthrough
CT: control target
= control target key end

     0   :  { %11 = vsyncpa [#allocation3], 0  ;;  %s1785_s0 = inlined_call_operand.hbm [shape: f32[8,8,128], index: 0, kind: input, shape index: {}]   ;;  %s1786_s1 = inlined_call_operand.hbm [shape: bf16[32,128], index: 1, kind: input, shape index: {}]   ;;  %s1787_s2 = inlined_call_operand.hbm [shape: bf16[64,128], index: 2, kind: input, shape index: {}]   ;;  %s1788_s3 = inlined_call_operand.vmem [shape: f32[1,128], index: 3, kind: input, shape index: {}]   ;;  %s1789_s4 = inlined_call_operand.vmem [shape: f32[1,32], index: 4, kind: input, shape index: {}]   ;;  %s1790_s5 = inlined_call_operand.vmem [shape: f32[1,32], index: 5, kind: input, shape index: {}]   ;;  %s1791_s6 = inlined_call_operand.hbm [shape: f32[8,128], index: 6, kind: output, shape index: {}]  }
   0x1   :  { %12 = vsyncpa [#allocation6], 0  ;;  %s31_s23 = sshll.u32 %s1786_s1, 4  ;;  %s32_s23 = int_to_ptr.hbm [resolvable:$true] %s31_s23 }
   0x2   :  { %13 = vsyncpa [#allocation4], 0  ;;  %s1487_s24 = smov [#allocation5]   ;;  %s18_s28 = sshll.u32 %s1785_s0, 4  ;;  %s19_s28 = int_to_ptr.hbm [resolvable:$true] %s18_s28 }
   0x3   :  { %s33_s25 = sshll.u32 %s1487_s24, 4  ;;  %s1488_s29 = smov 64   ;;  %s34_s25 = int_to_ptr.vmem [resolvable:$true] %s33_s25 }
   0x4   :  { %s1489_s30 = smov 4   ;;  %s1490_s7 = smov [#allocation2]  }
   0x5   :  { %39 = dma.hbm_to_vmem [thread:$0]  %s32_s23, 256, %s34_s25, [#allocation6], %s1488_s29, %s1488_s29, %s1489_s30  }
   0x6   :  { %s20_s8 = sshll.u32 %s1490_s7, 4  ;;  %s1491_s9 = smov 128   ;;  %s21_s8 = int_to_ptr.vmem [resolvable:$true] %s20_s8 }
   0x7   :  { %s1492_s1 = smov 8   ;;  %s44_s12 = sshll.u32 %s1787_s2, 4  ;;  %s45_s12 = int_to_ptr.hbm [resolvable:$true] %s44_s12 }
   0x8   :  { %26 = dma.hbm_to_vmem [thread:$0]  %s19_s28, 1024, %s21_s8, [#allocation3], %s1491_s9, %s1491_s9, %s1492_s1  }
   0x9   :  { %s1493_s13 = smov [#allocation7]  }
   0xa   :  { %s46_s14 = sshll.u32 %s1493_s13, 4  ;;  %s47_s14 = int_to_ptr.vmem [resolvable:$true] %s46_s14 }
   0xb   :  { %52 = dma.hbm_to_vmem [thread:$0]  %s45_s12, 512, %s47_s14, [#allocation6], %s1488_s29, %s1488_s29, %s1489_s30  }
   0xc   :  { %1481 = dma.done.wait [#allocation3], 1024  }
   0xd   :  { %1482 = vsyncadd [#allocation3], 4294966272 }
   0xe   :  { %1483 = dma.done.wait [#allocation6], 768  }
   0xf   :  { %1484 = vsyncadd [#allocation6], 4294966528  ;;  %v1547_v0 = vld [vmem:[#allocation5 + $0x8] sm:$0xff]  ;;  %v1550_v1 = vld [vmem:[#allocation5] sm:$0xff]  ;;  %v1494_v2 = vmov 0   ;;  %s1495_s0 = smov 32  }
  0x10   :  { %103 = vmatpush.bf16.msra.mxu0 %v1547_v0  ;;  %255 = vmatpush.bf16.msra.mxu2 %v1547_v0  ;;  %v76_v3 = vld [vmem:[#allocation2] sm:$0xff]  ;;  %v1565_v27 = vld [vmem:[#allocation7 + $0x18] sm:$0xff]  ;;  %v1573_v29 = vld [vmem:[#allocation7 + $0x8] sm:$0xff]  ;;  %vm93_vm4 = vcmask 261120   ;;  %vm186_vm5 = vcmask 523264   ;;  %s1497_s19 = smov 96  }
  0x11   :  { %194 = vmatpush.bf16.msra.mxu1 %v1565_v27  ;;  %v1568_v28 = vld [vmem:[#allocation7 + $0x10] sm:$0xff]  ;;  %317 = vmatpush.bf16.msra.mxu3 %v1565_v27  ;;  %v1582_v33 = vld [vmem:[#allocation7] sm:$0xff]  ;;  %v241_v43 = vld [vmem:[#allocation2 + $0x8] sm:$0xff]  ;;  %s1165_s24 = sshll.u32 %s1791_s6, 4  ;;  %s1166_s24 = int_to_ptr.hbm [resolvable:$true] %s1165_s24 }
  0x12   :  { %v1605_v38 = vld [vmem:[%s1788_s3] ss:$0 sm:$0xff] }
  0x14   :  { %104 = vmatpush.bf16.msra.mxu0 %v1550_v1  ;;  %256 = vmatpush.bf16.msra.mxu2 %v1550_v1 }
  0x15   :  { %195 = vmatpush.bf16.msra.mxu1 %v1568_v28  ;;  %318 = vmatpush.bf16.msra.mxu3 %v1568_v28 }
  0x17   :  { %105 = vmatmul.bf16.vlgmr.msra.gmra.mxu0 %v1494_v2 }
  0x18   :  { %378 = vmatpush.bf16.msrb.mxu0 %v1547_v0  ;;  %440 = vmatpush.bf16.msrb.mxu2 %v1565_v27 }
  0x19   :  { %196 = vmatpush.bf16.msra.mxu1 %v1573_v29  ;;  %319 = vmatpush.bf16.msra.mxu3 %v1573_v29 }
  0x1c   :  { %379 = vmatpush.bf16.msrb.mxu0 %v1550_v1  ;;  %441 = vmatpush.bf16.msrb.mxu2 %v1568_v28 }
  0x1d   :  { %197 = vmatpush.bf16.msra.mxu1 %v1582_v33  ;;  %320 = vmatpush.bf16.msra.mxu3 %v1582_v33 }
  0x20   :  { %624 = vmatpush.bf16.msra.mxu0 %v1547_v0  ;;  %442 = vmatpush.bf16.msrb.mxu2 %v1573_v29 }
  0x21   :  { %501 = vmatpush.bf16.msrb.mxu1 %v1547_v0  ;;  %563 = vmatpush.bf16.msrb.mxu3 %v1565_v27 }
  0x24   :  { %625 = vmatpush.bf16.msra.mxu0 %v1550_v1  ;;  %443 = vmatpush.bf16.msrb.mxu2 %v1582_v33 }
  0x25   :  { %502 = vmatpush.bf16.msrb.mxu1 %v1550_v1  ;;  %564 = vmatpush.bf16.msrb.mxu3 %v1568_v28 }
  0x29   :  { %565 = vmatpush.bf16.msrb.mxu3 %v1573_v29 }
  0x2d   :  { %566 = vmatpush.bf16.msrb.mxu3 %v1582_v33 }
  0x94   :  { %v106_v4 = vpop.f32.mrf.mxu0 }
  0x95   :  { %v110_v5 = vadd.f32 %v106_v4, %v76_v3 }
  0x97   :  { %1252 = vtanh.f32 %v110_v5  ;;  %v1184_v8 = vmul.f32 -1.442695, %v110_v5 }
  0x99   :  { %1254 = vpow2.f32 %v1184_v8 }
  0x9c   :  { %v108_v6 = vpop.f32.mrf.mxu0 }
  0x9d   :  { %v1253_v7 = vpop.eup %1252 }
  0x9e   :  { %133 = vrot.lane.b32.xlu0 %v1253_v7, %s1488_s29 }
  0x9f   :  { %v1255_v9 = vpop.eup %1254 }
  0xa0   :  { %v114_v10 = vadd.f32 1.0, %v1255_v9 }
  0xa2   :  { %1256 = vrcp.f32 %v114_v10  ;;  %v126_v16 = vand.u32 2147483648, %v114_v10  ;;  %vm120_vm1 = vweird.f32 %v114_v10  ;;  %v124_v17 = vand.u32 2147483647, %v114_v10 }
  0xa4   :  { %v127_v19 = vor.u32 1.1754944e-38, %v126_v16  ;;  %vm125_vm3 = vcmp.eq.f32.partialorder %v124_v17, 8.507059e+37 }
  0xa8   :  { %v1257_v11 = vpop.eup %1256 }
  0xa9   :  { %v116_v12 = vmul.f32 %v1257_v11, %v114_v10  ;;  %vm121_vm0 = vweird.f32 %v1257_v11 }
  0xaa   :  { %vm122_vm2 = vmor %vm120_vm1, %vm121_vm0 }
  0xab   :  { %v117_v13 = vsub.f32 1.0, %v116_v12 }
  0xad   :  { %v118_v14 = vmul.f32 %v1257_v11, %v117_v13 }
  0xaf   :  { %v119_v15 = vadd.f32 %v1257_v11, %v118_v14 }
  0xb1   :  { %v123_v18 = vsel %vm122_vm2, %v1257_v11, %v119_v15 }
  0xb2   :  { %v128_v21 = vsel %vm125_vm3, %v127_v19, %v123_v18 }
  0xb3   :  { %v131_v23 = vmul.f32 0.0, %v128_v21 }
 0x110   :  { %v134_v20 = vpop.permute.xlu0 %133 }
 0x111   :  { %v136_v22 = vmul.f32 %v134_v20, %v128_v21 }
 0x113   :  { %138 = vrot.lane.b32.xlu0 %v136_v22, %s1495_s0 }
 0x185   :  { %v139_v24 = vpop.permute.xlu0 %138 }
 0x186   :  { %v1561_v25 = vadd.f32 %v139_v24, %v131_v23 }
 0x188   :  { %1258 = vtanh.f32 %v1561_v25 }
 0x18e   :  { %v1259_v26 = vpop.eup %1258 }
 0x18f   :  { %144 = vrot.lane.b32.xlu1 %v1259_v26, %s1488_s29 }
 0x201   :  { %v145_v30 = vpop.permute.xlu1 %144 }
 0x202   :  { %v147_v31 = vmul.f32 %v145_v30, %v128_v21 }
 0x204   :  { %v242_v32 = vpack.c.bf16 %v147_v31, %v147_v31  ;;  %149 = vrot.lane.b32.xlu2 %v147_v31, %s1495_s0 }
 0x206   :  { %244 = vrot.lane.b32.xlu1 %v242_v32, %s1495_s0 }
 0x25e   :  { %v150_v34 = vpop.permute.xlu2 %149 }
 0x25f   :  { %v152_v35 = vsel %vm93_vm4, %v150_v34, 0.0 }
 0x260   :  { %v153_v36 = vpack.c.bf16 %v152_v35, %v152_v35 }
 0x262   :  { %1201 = vmatmul.msk.bf16.vlgmr.msra.gmra.mxu1 %vm186_vm5, %v153_v36 }
 0x263   :  { %747 = vmatpush.bf16.msra.mxu1 %v1547_v0 }
 0x267   :  { %748 = vmatpush.bf16.msra.mxu1 %v1550_v1 }
 0x278   :  { %v245_v37 = vpop.permute.xlu1 %244 }
 0x279   :  { %1203 = vmatmul.msk.bf16.vlgmr.msra.gmra.mxu2 %vm93_vm4, %v245_v37 }
 0x27a   :  { %686 = vmatpush.bf16.msra.mxu2 %v1565_v27 }
 0x27e   :  { %687 = vmatpush.bf16.msra.mxu2 %v1568_v28 }
 0x282   :  { %688 = vmatpush.bf16.msra.mxu2 %v1573_v29 }
 0x286   :  { %689 = vmatpush.bf16.msra.mxu2 %v1582_v33 }
 0x2df   :  { %v199_v39 = vpop.f32.mrf.mxu1 }
 0x2e0   :  { %v200_v40 = vadd.f32 %v1605_v38, %v199_v39 }
 0x2e2   :  { %1260 = vtanh.f32 %v200_v40  ;;  %v1202_v48 = vmul.f32 -1.442695, %v200_v40 }
 0x2e7   :  { %v201_v41 = vpop.f32.mrf.mxu1 }
 0x2e8   :  { %v1261_v42 = vpop.eup %1260 }
 0x2e9   :  { %225 = vrot.lane.b32.xlu2 %v1261_v42, %s1488_s29 }
 0x2fc   :  { %v258_v44 = vpop.f32.mrf.mxu2 }
 0x2fd   :  { %v262_v45 = vadd.f32 %v258_v44, %v241_v43  ;;  %v364_v43 = vld [vmem:[#allocation2 + $0x10] sm:$0xff] }
 0x2ff   :  { %1262 = vtanh.f32 %v262_v45  ;;  %v1204_v63 = vmul.f32 -1.442695, %v262_v45 }
 0x300   :  { %1264 = vpow2.f32 %v1202_v48 }
 0x304   :  { %v260_v46 = vpop.f32.mrf.mxu2 }
 0x305   :  { %v1263_v47 = vpop.eup %1262 }
 0x306   :  { %285 = vrot.lane.b32.xlu0 %v1263_v47, %s1488_s29  ;;  %v1265_v49 = vpop.eup %1264 }
 0x307   :  { %v206_v50 = vadd.f32 1.0, %v1265_v49 }
 0x309   :  { %1266 = vrcp.f32 %v206_v50  ;;  %v218_v56 = vand.u32 2147483648, %v206_v50  ;;  %vm212_vm7 = vweird.f32 %v206_v50  ;;  %v216_v57 = vand.u32 2147483647, %v206_v50 }
 0x30a   :  { %1268 = vpow2.f32 %v1204_v63 }
 0x30b   :  { %v219_v59 = vor.u32 1.1754944e-38, %v218_v56  ;;  %vm217_vm9 = vcmp.eq.f32.partialorder %v216_v57, 8.507059e+37 }
 0x30f   :  { %v1267_v51 = vpop.eup %1266 }
 0x310   :  { %v208_v52 = vmul.f32 %v1267_v51, %v206_v50  ;;  %vm213_vm6 = vweird.f32 %v1267_v51  ;;  %v1269_v2 = vpop.eup %1268 }
 0x311   :  { %vm214_vm8 = vmor %vm212_vm7, %vm213_vm6  ;;  %v266_v3 = vadd.f32 1.0, %v1269_v2 }
 0x312   :  { %v209_v53 = vsub.f32 1.0, %v208_v52 }
 0x313   :  { %1270 = vrcp.f32 %v266_v3  ;;  %v278_v9 = vand.u32 2147483648, %v266_v3  ;;  %vm272_vm11 = vweird.f32 %v266_v3  ;;  %v276_v10 = vand.u32 2147483647, %v266_v3 }
 0x314   :  { %v210_v54 = vmul.f32 %v1267_v51, %v209_v53 }
 0x315   :  { %v279_v12 = vor.u32 1.1754944e-38, %v278_v9  ;;  %vm277_vm13 = vcmp.eq.f32.partialorder %v276_v10, 8.507059e+37 }
 0x316   :  { %v211_v55 = vadd.f32 %v1267_v51, %v210_v54 }
 0x318   :  { %v215_v58 = vsel %vm214_vm8, %v1267_v51, %v211_v55 }
 0x319   :  { %v220_v61 = vsel %vm217_vm9, %v219_v59, %v215_v58  ;;  %v1271_v4 = vpop.eup %1270 }
 0x31a   :  { %v268_v5 = vmul.f32 %v1271_v4, %v266_v3  ;;  %vm273_vm10 = vweird.f32 %v1271_v4  ;;  %v223_v16 = vmul.f32 0.0, %v220_v61 }
 0x31b   :  { %vm274_vm12 = vmor %vm272_vm11, %vm273_vm10 }
 0x31c   :  { %v269_v6 = vsub.f32 1.0, %v268_v5 }
 0x31e   :  { %v270_v7 = vmul.f32 %v1271_v4, %v269_v6 }
 0x320   :  { %v271_v8 = vadd.f32 %v1271_v4, %v270_v7 }
 0x322   :  { %v275_v11 = vsel %vm274_vm12, %v1271_v4, %v271_v8 }
 0x323   :  { %v280_v14 = vsel %vm277_vm13, %v279_v12, %v275_v11 }
 0x324   :  { %v283_v20 = vmul.f32 %v280_v14, %v1561_v25 }
 0x343   :  { %v226_v60 = vpop.permute.xlu2 %225 }
 0x344   :  { %v228_v62 = vmul.f32 %v226_v60, %v220_v61 }
 0x346   :  { %230 = vrot.lane.b32.xlu1 %v228_v62, %s1495_s0 }
 0x378   :  { %v286_v13 = vpop.permute.xlu0 %285 }
 0x379   :  { %v288_v15 = vmul.f32 %v286_v13, %v280_v14 }
 0x37b   :  { %290 = vrot.lane.b32.xlu2 %v288_v15, %s1495_s0 }
 0x3b8   :  { %v231_v17 = vpop.permute.xlu1 %230 }
 0x3b9   :  { %v1612_v18 = vadd.f32 %v231_v17, %v223_v16 }
 0x3bb   :  { %1272 = vtanh.f32 %v1612_v18 }
 0x3c1   :  { %v1273_v19 = vpop.eup %1272 }
 0x3c2   :  { %236 = vrot.lane.b32.xlu0 %v1273_v19, %s1488_s29 }
 0x3d5   :  { %v291_v21 = vpop.permute.xlu2 %290 }
 0x3d6   :  { %v1617_v22 = vadd.f32 %v291_v21, %v283_v20 }
 0x3d8   :  { %1274 = vtanh.f32 %v1617_v22 }
 0x3de   :  { %v1275_v23 = vpop.eup %1274 }
 0x3df   :  { %296 = vrot.lane.b32.xlu1 %v1275_v23, %s1488_s29 }
 0x434   :  { %v237_v24 = vpop.permute.xlu0 %236 }
 0x435   :  { %v239_v26 = vmul.f32 %v237_v24, %v220_v61 }
 0x437   :  { %305 = vrot.lane.b32.xlu0 %v239_v26, %s1488_s29 }
 0x451   :  { %v297_v30 = vpop.permute.xlu1 %296 }
 0x452   :  { %v299_v31 = vmul.f32 %v297_v30, %v280_v14 }
 0x454   :  { %v365_v32 = vpack.c.bf16 %v299_v31, %v299_v31  ;;  %301 = vrot.lane.b32.xlu2 %v299_v31, %s1495_s0 }
 0x456   :  { %367 = vrot.lane.b32.xlu1 %v365_v32, %s1495_s0 }
 0x4a9   :  { %v306_v25 = vpop.permute.xlu0 %305 }
 0x4ae   :  { %v302_v34 = vpop.permute.xlu2 %301 }
 0x4af   :  { %v308_v35 = vsel %vm93_vm4, %v302_v34, %v306_v25 }
 0x4b0   :  { %v309_v36 = vpack.c.bf16 %v308_v35, %v308_v35 }
 0x4b2   :  { %1205 = vmatmul.msk.bf16.vlgmr.msra.gmra.mxu3 %vm186_vm5, %v309_v36 }
 0x4b3   :  { %809 = vmatpush.bf16.msra.mxu3 %v1565_v27 }
 0x4b7   :  { %810 = vmatpush.bf16.msra.mxu3 %v1568_v28 }
 0x4bb   :  { %811 = vmatpush.bf16.msra.mxu3 %v1573_v29 }
 0x4bf   :  { %812 = vmatpush.bf16.msra.mxu3 %v1582_v33 }
 0x4c8   :  { %v368_v37 = vpop.permute.xlu1 %367 }
 0x4c9   :  { %1207 = vmatmul.msk.bf16.vlgmr.msrb.gmra.mxu0 %vm93_vm4, %v368_v37 }
 0x4ca   :  { %870 = vmatpush.bf16.msrb.mxu0 %v1547_v0 }
 0x4ce   :  { %871 = vmatpush.bf16.msrb.mxu0 %v1550_v1 }
 0x535   :  { %v322_v39 = vpop.f32.mrf.mxu3 }
 0x536   :  { %v323_v40 = vadd.f32 %v1605_v38, %v322_v39 }
 0x538   :  { %1276 = vtanh.f32 %v323_v40  ;;  %v1206_v48 = vmul.f32 -1.442695, %v323_v40 }
 0x53d   :  { %v324_v41 = vpop.f32.mrf.mxu3 }
 0x53e   :  { %v1277_v42 = vpop.eup %1276 }
 0x53f   :  { %348 = vrot.lane.b32.xlu2 %v1277_v42, %s1488_s29  ;;  %v487_v42 = vld [vmem:[#allocation2 + $0x18] sm:$0xff] }
 0x546   :  { %v381_v44 = vpop.f32.mrf.mxu0 }
 0x547   :  { %v385_v45 = vadd.f32 %v381_v44, %v364_v43 }
 0x549   :  { %1278 = vtanh.f32 %v385_v45  ;;  %v1208_v58 = vmul.f32 -1.442695, %v385_v45 }
 0x54a   :  { %1280 = vpow2.f32 %v1206_v48 }
 0x54e   :  { %v383_v46 = vpop.f32.mrf.mxu0 }
 0x54f   :  { %v1279_v47 = vpop.eup %1278 }
 0x550   :  { %408 = vrot.lane.b32.xlu0 %v1279_v47, %s1488_s29  ;;  %v1281_v49 = vpop.eup %1280 }
 0x551   :  { %v329_v50 = vadd.f32 1.0, %v1281_v49 }
 0x553   :  { %1282 = vrcp.f32 %v329_v50  ;;  %v341_v56 = vand.u32 2147483648, %v329_v50  ;;  %vm335_vm15 = vweird.f32 %v329_v50  ;;  %v339_v57 = vand.u32 2147483647, %v329_v50 }
 0x554   :  { %1284 = vpow2.f32 %v1208_v58 }
 0x555   :  { %v342_v60 = vor.u32 1.1754944e-38, %v341_v56  ;;  %vm340_vm1 = vcmp.eq.f32.partialorder %v339_v57, 8.507059e+37 }
 0x559   :  { %v1283_v51 = vpop.eup %1282 }
 0x55a   :  { %v331_v52 = vmul.f32 %v1283_v51, %v329_v50  ;;  %vm336_vm14 = vweird.f32 %v1283_v51  ;;  %v1285_v2 = vpop.eup %1284 }
 0x55b   :  { %vm337_vm0 = vmor %vm335_vm15, %vm336_vm14  ;;  %v389_v3 = vadd.f32 1.0, %v1285_v2 }
 0x55c   :  { %v332_v53 = vsub.f32 1.0, %v331_v52 }
 0x55d   :  { %1286 = vrcp.f32 %v389_v3  ;;  %v401_v9 = vand.u32 2147483648, %v389_v3  ;;  %vm395_vm3 = vweird.f32 %v389_v3  ;;  %v399_v10 = vand.u32 2147483647, %v389_v3 }
 0x55e   :  { %v333_v54 = vmul.f32 %v1283_v51, %v332_v53 }
 0x55f   :  { %v402_v12 = vor.u32 1.1754944e-38, %v401_v9  ;;  %vm400_vm7 = vcmp.eq.f32.partialorder %v399_v10, 8.507059e+37 }
 0x560   :  { %v334_v55 = vadd.f32 %v1283_v51, %v333_v54 }
 0x562   :  { %v338_v59 = vsel %vm337_vm0, %v1283_v51, %v334_v55 }
 0x563   :  { %v343_v62 = vsel %vm340_vm1, %v342_v60, %v338_v59  ;;  %v1287_v4 = vpop.eup %1286 }
 0x564   :  { %v391_v5 = vmul.f32 %v1287_v4, %v389_v3  ;;  %vm396_vm2 = vweird.f32 %v1287_v4  ;;  %v346_v16 = vmul.f32 %v343_v62, %v1612_v18 }
 0x565   :  { %vm397_vm6 = vmor %vm395_vm3, %vm396_vm2 }
 0x566   :  { %v392_v6 = vsub.f32 1.0, %v391_v5 }
 0x568   :  { %v393_v7 = vmul.f32 %v1287_v4, %v392_v6 }
 0x56a   :  { %v394_v8 = vadd.f32 %v1287_v4, %v393_v7 }
 0x56c   :  { %v398_v11 = vsel %vm397_vm6, %v1287_v4, %v394_v8 }
 0x56d   :  { %v403_v13 = vsel %vm400_vm7, %v402_v12, %v398_v11 }
 0x56e   :  { %v406_v21 = vmul.f32 %v403_v13, %v1617_v22 }
 0x599   :  { %v349_v61 = vpop.permute.xlu2 %348 }
 0x59a   :  { %v351_v63 = vmul.f32 %v349_v61, %v343_v62 }
 0x59c   :  { %353 = vrot.lane.b32.xlu1 %v351_v63, %s1495_s0 }
 0x5c2   :  { %v409_v14 = vpop.permute.xlu0 %408 }
 0x5c3   :  { %v411_v15 = vmul.f32 %v409_v14, %v403_v13 }
 0x5c5   :  { %413 = vrot.lane.b32.xlu2 %v411_v15, %s1495_s0 }
 0x60e   :  { %v354_v17 = vpop.permute.xlu1 %353 }
 0x60f   :  { %v1639_v19 = vadd.f32 %v354_v17, %v346_v16 }
 0x611   :  { %1288 = vtanh.f32 %v1639_v19 }
 0x617   :  { %v1289_v20 = vpop.eup %1288 }
 0x618   :  { %359 = vrot.lane.b32.xlu0 %v1289_v20, %s1488_s29 }
 0x61f   :  { %v414_v23 = vpop.permute.xlu2 %413 }
 0x620   :  { %v1644_v24 = vadd.f32 %v414_v23, %v406_v21 }
 0x622   :  { %1290 = vtanh.f32 %v1644_v24 }
 0x628   :  { %v1291_v26 = vpop.eup %1290 }
 0x629   :  { %419 = vrot.lane.b32.xlu1 %v1291_v26, %s1488_s29 }
 0x68a   :  { %v360_v30 = vpop.permute.xlu0 %359 }
 0x68b   :  { %v362_v18 = vmul.f32 %v360_v30, %v343_v62 }
 0x68d   :  { %428 = vrot.lane.b32.xlu0 %v362_v18, %s1488_s29 }
 0x69b   :  { %v420_v31 = vpop.permute.xlu1 %419 }
 0x69c   :  { %v422_v32 = vmul.f32 %v420_v31, %v403_v13 }
 0x69e   :  { %v488_v25 = vpack.c.bf16 %v422_v32, %v422_v32  ;;  %424 = vrot.lane.b32.xlu2 %v422_v32, %s1495_s0 }
 0x6a0   :  { %490 = vrot.lane.b32.xlu1 %v488_v25, %s1495_s0 }
 0x6f8   :  { %v425_v22 = vpop.permute.xlu2 %424 }
 0x6ff   :  { %v429_v34 = vpop.permute.xlu0 %428 }
 0x700   :  { %v431_v35 = vsel %vm93_vm4, %v425_v22, %v429_v34 }
 0x701   :  { %v432_v36 = vpack.c.bf16 %v431_v35, %v431_v35 }
 0x703   :  { %1209 = vmatmul.msk.bf16.vlgmr.msrb.gmra.mxu2 %vm186_vm5, %v432_v36 }
 0x704   :  { %932 = vmatpush.bf16.msrb.mxu2 %v1565_v27 }
 0x708   :  { %933 = vmatpush.bf16.msrb.mxu2 %v1568_v28 }
 0x70c   :  { %934 = vmatpush.bf16.msrb.mxu2 %v1573_v29 }
 0x710   :  { %935 = vmatpush.bf16.msrb.mxu2 %v1582_v33 }
 0x712   :  { %v491_v37 = vpop.permute.xlu1 %490 }
 0x713   :  { %1211 = vmatmul.msk.bf16.vlgmr.msrb.gmra.mxu1 %vm93_vm4, %v491_v37 }
 0x714   :  { %993 = vmatpush.bf16.msrb.mxu1 %v1547_v0 }
 0x718   :  { %994 = vmatpush.bf16.msrb.mxu1 %v1550_v1 }
 0x786   :  { %v445_v39 = vpop.f32.mrf.mxu2 }
 0x787   :  { %v446_v40 = vadd.f32 %v1605_v38, %v445_v39  ;;  %v610_v39 = vld [vmem:[#allocation2 + $0x20] sm:$0xff] }
 0x789   :  { %1292 = vtanh.f32 %v446_v40  ;;  %v1210_v48 = vmul.f32 -1.442695, %v446_v40 }
 0x78e   :  { %v447_v41 = vpop.f32.mrf.mxu2 }
 0x78f   :  { %v1293_v43 = vpop.eup %1292 }
 0x790   :  { %v504_v44 = vpop.f32.mrf.mxu1  ;;  %471 = vrot.lane.b32.xlu2 %v1293_v43, %s1488_s29 }
 0x791   :  { %v508_v45 = vadd.f32 %v504_v44, %v487_v42 }
 0x793   :  { %1294 = vtanh.f32 %v508_v45  ;;  %v1212_v52 = vmul.f32 -1.442695, %v508_v45 }
 0x794   :  { %1296 = vpow2.f32 %v1210_v48 }
 0x798   :  { %v506_v46 = vpop.f32.mrf.mxu1 }
 0x799   :  { %v1295_v47 = vpop.eup %1294 }
 0x79a   :  { %531 = vrot.lane.b32.xlu0 %v1295_v47, %s1488_s29  ;;  %v1297_v0 = vpop.eup %1296 }
 0x79b   :  { %v452_v1 = vadd.f32 1.0, %v1297_v0 }
 0x79d   :  { %1298 = vrcp.f32 %v452_v1  ;;  %v464_v55 = vand.u32 2147483648, %v452_v1  ;;  %vm458_vm9 = vweird.f32 %v452_v1  ;;  %v462_v56 = vand.u32 2147483647, %v452_v1 }
 0x79e   :  { %1300 = vpow2.f32 %v1212_v52 }
 0x79f   :  { %v465_v58 = vor.u32 1.1754944e-38, %v464_v55  ;;  %vm463_vm11 = vcmp.eq.f32.partialorder %v462_v56, 8.507059e+37 }
 0x7a3   :  { %v1299_v49 = vpop.eup %1298 }
 0x7a4   :  { %v454_v50 = vmul.f32 %v1299_v49, %v452_v1  ;;  %vm459_vm8 = vweird.f32 %v1299_v49  ;;  %v1301_v59 = vpop.eup %1300 }
 0x7a5   :  { %vm460_vm10 = vmor %vm458_vm9, %vm459_vm8  ;;  %v512_v63 = vadd.f32 1.0, %v1301_v59 }
 0x7a6   :  { %v455_v51 = vsub.f32 1.0, %v454_v50 }
 0x7a7   :  { %1302 = vrcp.f32 %v512_v63  ;;  %v524_v7 = vand.u32 2147483648, %v512_v63  ;;  %vm518_vm13 = vweird.f32 %v512_v63  ;;  %v522_v8 = vand.u32 2147483647, %v512_v63 }
 0x7a8   :  { %v456_v53 = vmul.f32 %v1299_v49, %v455_v51 }
 0x7a9   :  { %v525_v10 = vor.u32 1.1754944e-38, %v524_v7  ;;  %vm523_vm15 = vcmp.eq.f32.partialorder %v522_v8, 8.507059e+37 }
 0x7aa   :  { %v457_v54 = vadd.f32 %v1299_v49, %v456_v53 }
 0x7ac   :  { %v461_v57 = vsel %vm460_vm10, %v1299_v49, %v457_v54 }
 0x7ad   :  { %v466_v61 = vsel %vm463_vm11, %v465_v58, %v461_v57  ;;  %v1303_v2 = vpop.eup %1302 }
 0x7ae   :  { %v514_v3 = vmul.f32 %v1303_v2, %v512_v63  ;;  %vm519_vm12 = vweird.f32 %v1303_v2  ;;  %v469_v14 = vmul.f32 %v466_v61, %v1639_v19 }
 0x7af   :  { %vm520_vm14 = vmor %vm518_vm13, %vm519_vm12 }
 0x7b0   :  { %v515_v4 = vsub.f32 1.0, %v514_v3 }
 0x7b2   :  { %v516_v5 = vmul.f32 %v1303_v2, %v515_v4 }
 0x7b4   :  { %v517_v6 = vadd.f32 %v1303_v2, %v516_v5 }
 0x7b6   :  { %v521_v9 = vsel %vm520_vm14, %v1303_v2, %v517_v6 }
 0x7b7   :  { %v526_v11 = vsel %vm523_vm15, %v525_v10, %v521_v9 }
 0x7b8   :  { %v529_v20 = vmul.f32 %v526_v11, %v1644_v24 }
 0x7ea   :  { %v472_v60 = vpop.permute.xlu2 %471 }
 0x7eb   :  { %v474_v62 = vmul.f32 %v472_v60, %v466_v61 }
 0x7ed   :  { %476 = vrot.lane.b32.xlu1 %v474_v62, %s1495_s0 }
 0x80c   :  { %v532_v12 = vpop.permute.xlu0 %531 }
 0x80d   :  { %v534_v13 = vmul.f32 %v532_v12, %v526_v11 }
 0x80f   :  { %536 = vrot.lane.b32.xlu2 %v534_v13, %s1495_s0 }
 0x85f   :  { %v477_v15 = vpop.permute.xlu1 %476 }
 0x860   :  { %v1666_v16 = vadd.f32 %v477_v15, %v469_v14 }
 0x862   :  { %1304 = vtanh.f32 %v1666_v16 }
 0x868   :  { %v1305_v17 = vpop.eup %1304 }
 0x869   :  { %482 = vrot.lane.b32.xlu0 %v1305_v17, %s1488_s29  ;;  %v537_v21 = vpop.permute.xlu2 %536 }
 0x86a   :  { %v1671_v23 = vadd.f32 %v537_v21, %v529_v20 }
 0x86c   :  { %1306 = vtanh.f32 %v1671_v23 }
 0x872   :  { %v1307_v26 = vpop.eup %1306 }
 0x873   :  { %542 = vrot.lane.b32.xlu1 %v1307_v26, %s1488_s29 }
 0x8db   :  { %v483_v30 = vpop.permute.xlu0 %482 }
 0x8dc   :  { %v485_v19 = vmul.f32 %v483_v30, %v466_v61 }
 0x8de   :  { %551 = vrot.lane.b32.xlu0 %v485_v19, %s1488_s29 }
 0x8e5   :  { %v543_v18 = vpop.permute.xlu1 %542 }
 0x8e6   :  { %v545_v31 = vmul.f32 %v543_v18, %v526_v11 }
 0x8e8   :  { %v611_v32 = vpack.c.bf16 %v545_v31, %v545_v31  ;;  %547 = vrot.lane.b32.xlu2 %v545_v31, %s1495_s0 }
 0x8ea   :  { %613 = vrot.lane.b32.xlu1 %v611_v32, %s1495_s0  ;;  %v733_v32 = vld [vmem:[#allocation2 + $0x28] sm:$0xff] }
 0x942   :  { %v548_v24 = vpop.permute.xlu2 %547 }
 0x950   :  { %v552_v25 = vpop.permute.xlu0 %551 }
 0x951   :  { %v554_v22 = vsel %vm93_vm4, %v548_v24, %v552_v25 }
 0x952   :  { %v555_v34 = vpack.c.bf16 %v554_v22, %v554_v22 }
 0x954   :  { %1213 = vmatmul.msk.bf16.vlgmr.msrb.gmra.mxu3 %vm186_vm5, %v555_v34 }
 0x955   :  { %1055 = vmatpush.bf16.msrb.mxu3 %v1565_v27 }
 0x959   :  { %1056 = vmatpush.bf16.msrb.mxu3 %v1568_v28 }
 0x95c   :  { %v614_v35 = vpop.permute.xlu1 %613 }
 0x95d   :  { %1215 = vmatmul.msk.bf16.vlgmr.msra.gmra.mxu0 %vm93_vm4, %v614_v35  ;;  %1057 = vmatpush.bf16.msrb.mxu3 %v1573_v29 }
 0x961   :  { %1058 = vmatpush.bf16.msrb.mxu3 %v1582_v33 }
 0x9d7   :  { %v568_v36 = vpop.f32.mrf.mxu3 }
 0x9d8   :  { %v569_v37 = vadd.f32 %v1605_v38, %v568_v36 }
 0x9da   :  { %1308 = vtanh.f32 %v569_v37  ;;  %v627_v40 = vpop.f32.mrf.mxu0  ;;  %v1214_v44 = vmul.f32 -1.442695, %v569_v37 }
 0x9db   :  { %v631_v41 = vadd.f32 %v627_v40, %v610_v39 }
 0x9dd   :  { %1310 = vtanh.f32 %v631_v41  ;;  %v1216_v47 = vmul.f32 -1.442695, %v631_v41 }
 0x9de   :  { %1312 = vpow2.f32 %v1214_v44 }
 0x9df   :  { %v570_v42 = vpop.f32.mrf.mxu3 }
 0x9e0   :  { %v1309_v43 = vpop.eup %1308 }
 0x9e1   :  { %594 = vrot.lane.b32.xlu2 %v1309_v43, %s1488_s29 }
 0x9e2   :  { %v629_v27 = vpop.f32.mrf.mxu0 }
 0x9e3   :  { %v1311_v28 = vpop.eup %1310 }
 0x9e4   :  { %654 = vrot.lane.b32.xlu0 %v1311_v28, %s1488_s29  ;;  %v1313_v29 = vpop.eup %1312 }
 0x9e5   :  { %v575_v33 = vadd.f32 1.0, %v1313_v29 }
 0x9e7   :  { %1314 = vrcp.f32 %v575_v33  ;;  %v587_v50 = vand.u32 2147483648, %v575_v33  ;;  %vm581_vm1 = vweird.f32 %v575_v33  ;;  %v585_v52 = vand.u32 2147483647, %v575_v33 }
 0x9e8   :  { %1316 = vpow2.f32 %v1216_v47 }
 0x9e9   :  { %v588_v54 = vor.u32 1.1754944e-38, %v587_v50  ;;  %vm586_vm3 = vcmp.eq.f32.partialorder %v585_v52, 8.507059e+37 }
 0x9ed   :  { %v1315_v45 = vpop.eup %1314 }
 0x9ee   :  { %v577_v46 = vmul.f32 %v1315_v45, %v575_v33  ;;  %v1317_v1 = vpop.eup %1316  ;;  %vm582_vm0 = vweird.f32 %v1315_v45 }
 0x9ef   :  { %v635_v51 = vadd.f32 1.0, %v1317_v1  ;;  %vm583_vm2 = vmor %vm581_vm1, %vm582_vm0 }
 0x9f0   :  { %v578_v48 = vsub.f32 1.0, %v577_v46 }
 0x9f1   :  { %1318 = vrcp.f32 %v635_v51  ;;  %v647_v63 = vand.u32 2147483648, %v635_v51  ;;  %vm641_vm7 = vweird.f32 %v635_v51  ;;  %v645_v2 = vand.u32 2147483647, %v635_v51 }
 0x9f2   :  { %v579_v0 = vmul.f32 %v1315_v45, %v578_v48 }
 0x9f3   :  { %v648_v4 = vor.u32 1.1754944e-38, %v647_v63  ;;  %vm646_vm9 = vcmp.eq.f32.partialorder %v645_v2, 8.507059e+37 }
 0x9f4   :  { %v580_v49 = vadd.f32 %v1315_v45, %v579_v0 }
 0x9f6   :  { %v584_v53 = vsel %vm583_vm2, %v1315_v45, %v580_v49 }
 0x9f7   :  { %v589_v56 = vsel %vm586_vm3, %v588_v54, %v584_v53  ;;  %v1319_v58 = vpop.eup %1318 }
 0x9f8   :  { %v637_v59 = vmul.f32 %v1319_v58, %v635_v51  ;;  %vm642_vm6 = vweird.f32 %v1319_v58  ;;  %v592_v8 = vmul.f32 %v589_v56, %v1666_v16 }
 0x9f9   :  { %vm643_vm8 = vmor %vm641_vm7, %vm642_vm6 }
 0x9fa   :  { %v638_v60 = vsub.f32 1.0, %v637_v59 }
 0x9fc   :  { %v639_v61 = vmul.f32 %v1319_v58, %v638_v60 }
 0x9fe   :  { %v640_v62 = vadd.f32 %v1319_v58, %v639_v61 }
 0xa00   :  { %v644_v3 = vsel %vm643_vm8, %v1319_v58, %v640_v62 }
 0xa01   :  { %v649_v5 = vsel %vm646_vm9, %v648_v4, %v644_v3 }
 0xa02   :  { %v652_v11 = vmul.f32 %v649_v5, %v1671_v23 }
 0xa3b   :  { %v595_v55 = vpop.permute.xlu2 %594 }
 0xa3c   :  { %v597_v57 = vmul.f32 %v595_v55, %v589_v56 }
 0xa3e   :  { %599 = vrot.lane.b32.xlu1 %v597_v57, %s1495_s0 }
 0xa56   :  { %v655_v6 = vpop.permute.xlu0 %654 }
 0xa57   :  { %v657_v7 = vmul.f32 %v655_v6, %v649_v5 }
 0xa59   :  { %659 = vrot.lane.b32.xlu2 %v657_v7, %s1495_s0 }
 0xab0   :  { %v600_v9 = vpop.permute.xlu1 %599 }
 0xab1   :  { %v1691_v10 = vadd.f32 %v600_v9, %v592_v8 }
 0xab3   :  { %1320 = vtanh.f32 %v1691_v10  ;;  %v660_v12 = vpop.permute.xlu2 %659 }
 0xab4   :  { %v1695_v13 = vadd.f32 %v660_v12, %v652_v11 }
 0xab6   :  { %1322 = vtanh.f32 %v1695_v13 }
 0xab9   :  { %v1321_v14 = vpop.eup %1320 }
 0xaba   :  { %605 = vrot.lane.b32.xlu0 %v1321_v14, %s1488_s29 }
 0xabc   :  { %v1323_v15 = vpop.eup %1322 }
 0xabd   :  { %665 = vrot.lane.b32.xlu1 %v1323_v15, %s1488_s29 }
 0xb2c   :  { %v606_v17 = vpop.permute.xlu0 %605 }
 0xb2d   :  { %v608_v16 = vmul.f32 %v606_v17, %v589_v56 }
 0xb2f   :  { %v666_v20 = vpop.permute.xlu1 %665  ;;  %674 = vrot.lane.b32.xlu0 %v608_v16, %s1488_s29 }
 0xb30   :  { %v668_v21 = vmul.f32 %v666_v20, %v649_v5 }
 0xb32   :  { %v734_v23 = vpack.c.bf16 %v668_v21, %v668_v21  ;;  %670 = vrot.lane.b32.xlu2 %v668_v21, %s1495_s0 }
 0xb34   :  { %736 = vrot.lane.b32.xlu1 %v734_v23, %s1495_s0  ;;  %v856_v23 = vld [vmem:[#allocation2 + $0x30] sm:$0xff] }
 0xb8c   :  { %v671_v26 = vpop.permute.xlu2 %670 }
 0xba1   :  { %v675_v30 = vpop.permute.xlu0 %674 }
 0xba2   :  { %v677_v19 = vsel %vm93_vm4, %v671_v26, %v675_v30 }
 0xba3   :  { %v678_v18 = vpack.c.bf16 %v677_v19, %v677_v19 }
 0xba5   :  { %1217 = vmatmul.msk.bf16.vlgmr.msra.gmra.mxu2 %vm186_vm5, %v678_v18 }
 0xba6   :  { %v737_v31 = vpop.permute.xlu1 %736 }
 0xba7   :  { %1219 = vmatmul.msk.bf16.vlgmr.msra.gmra.mxu1 %vm93_vm4, %v737_v31 }
 0xc24   :  { %v750_v24 = vpop.f32.mrf.mxu1 }
 0xc25   :  { %v754_v25 = vadd.f32 %v750_v24, %v733_v32 }
 0xc27   :  { %1324 = vtanh.f32 %v754_v25  ;;  %v1220_v43 = vmul.f32 -1.442695, %v754_v25 }
 0xc28   :  { %v691_v22 = vpop.f32.mrf.mxu2 }
 0xc29   :  { %v692_v34 = vadd.f32 %v1605_v38, %v691_v22 }
 0xc2b   :  { %1326 = vtanh.f32 %v692_v34  ;;  %v1218_v40 = vmul.f32 -1.442695, %v692_v34 }
 0xc2c   :  { %v752_v35 = vpop.f32.mrf.mxu1 }
 0xc2d   :  { %v1325_v36 = vpop.eup %1324  ;;  %1328 = vpow2.f32 %v1218_v40 }
 0xc2e   :  { %777 = vrot.lane.b32.xlu0 %v1325_v36, %s1488_s29 }
 0xc30   :  { %v693_v37 = vpop.f32.mrf.mxu2 }
 0xc31   :  { %v1327_v39 = vpop.eup %1326 }
 0xc32   :  { %717 = vrot.lane.b32.xlu2 %v1327_v39, %s1488_s29 }
 0xc33   :  { %v1329_v41 = vpop.eup %1328 }
 0xc34   :  { %v698_v42 = vadd.f32 1.0, %v1329_v41 }
 0xc36   :  { %1330 = vrcp.f32 %v698_v42  ;;  %v710_v47 = vand.u32 2147483648, %v698_v42  ;;  %vm704_vm11 = vweird.f32 %v698_v42  ;;  %v708_v48 = vand.u32 2147483647, %v698_v42 }
 0xc37   :  { %1332 = vpow2.f32 %v1220_v43 }
 0xc38   :  { %v711_v49 = vor.u32 1.1754944e-38, %v710_v47  ;;  %vm709_vm13 = vcmp.eq.f32.partialorder %v708_v48, 8.507059e+37 }
 0xc3c   :  { %v1331_v27 = vpop.eup %1330 }
 0xc3d   :  { %v700_v28 = vmul.f32 %v1331_v27, %v698_v42  ;;  %v1333_v44 = vpop.eup %1332  ;;  %vm705_vm10 = vweird.f32 %v1331_v27 }
 0xc3e   :  { %v758_v33 = vadd.f32 1.0, %v1333_v44  ;;  %vm706_vm12 = vmor %vm704_vm11, %vm705_vm10 }
 0xc3f   :  { %v701_v29 = vsub.f32 1.0, %v700_v28 }
 0xc40   :  { %1334 = vrcp.f32 %v758_v33  ;;  %v770_v57 = vand.u32 2147483648, %v758_v33  ;;  %vm764_vm15 = vweird.f32 %v758_v33  ;;  %v768_v58 = vand.u32 2147483647, %v758_v33 }
 0xc41   :  { %v702_v45 = vmul.f32 %v1331_v27, %v701_v29 }
 0xc42   :  { %v771_v60 = vor.u32 1.1754944e-38, %v770_v57  ;;  %vm769_vm1 = vcmp.eq.f32.partialorder %v768_v58, 8.507059e+37 }
 0xc43   :  { %v703_v46 = vadd.f32 %v1331_v27, %v702_v45 }
 0xc45   :  { %v707_v0 = vsel %vm706_vm12, %v1331_v27, %v703_v46 }
 0xc46   :  { %v1335_v1 = vpop.eup %1334  ;;  %v712_v51 = vsel %vm709_vm13, %v711_v49, %v707_v0 }
 0xc47   :  { %v760_v53 = vmul.f32 %v1335_v1, %v758_v33  ;;  %vm765_vm14 = vweird.f32 %v1335_v1  ;;  %v715_v5 = vmul.f32 %v712_v51, %v1691_v10 }
 0xc48   :  { %vm766_vm0 = vmor %vm764_vm15, %vm765_vm14 }
 0xc49   :  { %v761_v54 = vsub.f32 1.0, %v760_v53 }
 0xc4b   :  { %v762_v55 = vmul.f32 %v1335_v1, %v761_v54 }
 0xc4d   :  { %v763_v56 = vadd.f32 %v1335_v1, %v762_v55 }
 0xc4f   :  { %v767_v59 = vsel %vm766_vm0, %v1335_v1, %v763_v56 }
 0xc50   :  { %v772_v61 = vsel %vm769_vm1, %v771_v60, %v767_v59 }
 0xc51   :  { %v775_v2 = vmul.f32 %v772_v61, %v1695_v13 }
 0xc8c   :  { %v718_v50 = vpop.permute.xlu2 %717 }
 0xc8d   :  { %v720_v52 = vmul.f32 %v718_v50, %v712_v51 }
 0xc8f   :  { %722 = vrot.lane.b32.xlu1 %v720_v52, %s1495_s0 }
 0xca0   :  { %v778_v62 = vpop.permute.xlu0 %777 }
 0xca1   :  { %v780_v63 = vmul.f32 %v778_v62, %v772_v61 }
 0xca3   :  { %782 = vrot.lane.b32.xlu2 %v780_v63, %s1495_s0 }
 0xcfd   :  { %v783_v3 = vpop.permute.xlu2 %782 }
 0xcfe   :  { %v1712_v4 = vadd.f32 %v783_v3, %v775_v2 }
 0xd00   :  { %1336 = vtanh.f32 %v1712_v4 }
 0xd01   :  { %v723_v6 = vpop.permute.xlu1 %722 }
 0xd02   :  { %v1716_v7 = vadd.f32 %v723_v6, %v715_v5 }
 0xd04   :  { %1338 = vtanh.f32 %v1716_v7 }
 0xd06   :  { %v1337_v8 = vpop.eup %1336 }
 0xd07   :  { %788 = vrot.lane.b32.xlu1 %v1337_v8, %s1488_s29 }
 0xd0a   :  { %v1339_v9 = vpop.eup %1338 }
 0xd0b   :  { %728 = vrot.lane.b32.xlu0 %v1339_v9, %s1488_s29 }
 0xd79   :  { %v789_v11 = vpop.permute.xlu1 %788 }
 0xd7a   :  { %v791_v12 = vmul.f32 %v789_v11, %v772_v61 }
 0xd7c   :  { %v857_v13 = vpack.c.bf16 %v791_v12, %v791_v12  ;;  %793 = vrot.lane.b32.xlu2 %v791_v12, %s1495_s0 }
 0xd7d   :  { %v729_v14 = vpop.permute.xlu0 %728 }
 0xd7e   :  { %v731_v15 = vmul.f32 %v729_v14, %v712_v51  ;;  %859 = vrot.lane.b32.xlu1 %v857_v13, %s1495_s0  ;;  %v979_v14 = vld [vmem:[#allocation2 + $0x38] sm:$0xff] }
 0xd80   :  { %797 = vrot.lane.b32.xlu0 %v731_v15, %s1488_s29 }
 0xdd6   :  { %v794_v17 = vpop.permute.xlu2 %793 }
 0xdf0   :  { %v860_v10 = vpop.permute.xlu1 %859 }
 0xdf1   :  { %1223 = vmatmul.msk.bf16.vlgmr.msrb.gmra.mxu0 %vm93_vm4, %v860_v10 }
 0xdf2   :  { %v798_v16 = vpop.permute.xlu0 %797 }
 0xdf3   :  { %v800_v20 = vsel %vm93_vm4, %v794_v17, %v798_v16 }
 0xdf4   :  { %v801_v21 = vpack.c.bf16 %v800_v20, %v800_v20 }
 0xdf6   :  { %1221 = vmatmul.msk.bf16.vlgmr.msra.gmra.mxu3 %vm186_vm5, %v801_v21  ;;  %v1752_v21 = vld [vmem:[%s1788_s3] ss:$0 sm:$0xff] }
 0xe6e   :  { %v873_v26 = vpop.f32.mrf.mxu0 }
 0xe6f   :  { %v877_v30 = vadd.f32 %v873_v26, %v856_v23 }
 0xe71   :  { %1340 = vtanh.f32 %v877_v30  ;;  %v1224_v35 = vmul.f32 -1.442695, %v877_v30 }
 0xe76   :  { %v875_v19 = vpop.f32.mrf.mxu0 }
 0xe77   :  { %v1341_v18 = vpop.eup %1340 }
 0xe78   :  { %900 = vrot.lane.b32.xlu0 %v1341_v18, %s1488_s29 }
 0xe79   :  { %v814_v31 = vpop.f32.mrf.mxu3 }
 0xe7a   :  { %v815_v32 = vadd.f32 %v1605_v38, %v814_v31 }
 0xe7c   :  { %1342 = vtanh.f32 %v815_v32  ;;  %v1222_v22 = vmul.f32 -1.442695, %v815_v32 }
 0xe7e   :  { %1344 = vpow2.f32 %v1222_v22 }
 0xe7f   :  { %1346 = vpow2.f32 %v1224_v35 }
 0xe81   :  { %v816_v24 = vpop.f32.mrf.mxu3 }
 0xe82   :  { %v1343_v25 = vpop.eup %1342 }
 0xe83   :  { %840 = vrot.lane.b32.xlu2 %v1343_v25, %s1488_s29 }
 0xe84   :  { %v1345_v34 = vpop.eup %1344 }
 0xe85   :  { %v821_v36 = vadd.f32 1.0, %v1345_v34  ;;  %v1347_v37 = vpop.eup %1346 }
 0xe86   :  { %v881_v40 = vadd.f32 1.0, %v1347_v37 }
 0xe87   :  { %1348 = vrcp.f32 %v821_v36  ;;  %v833_v44 = vand.u32 2147483648, %v821_v36  ;;  %vm827_vm3 = vweird.f32 %v821_v36  ;;  %v831_v29 = vand.u32 2147483647, %v821_v36 }
 0xe88   :  { %1350 = vrcp.f32 %v881_v40  ;;  %v893_v50 = vand.u32 2147483648, %v881_v40  ;;  %vm887_vm9 = vweird.f32 %v881_v40  ;;  %v891_v51 = vand.u32 2147483647, %v881_v40 }
 0xe89   :  { %v834_v46 = vor.u32 1.1754944e-38, %v833_v44  ;;  %vm832_vm7 = vcmp.eq.f32.partialorder %v831_v29, 8.507059e+37 }
 0xe8a   :  { %v894_v53 = vor.u32 1.1754944e-38, %v893_v50  ;;  %vm892_vm11 = vcmp.eq.f32.partialorder %v891_v51, 8.507059e+37 }
 0xe8d   :  { %v1349_v39 = vpop.eup %1348 }
 0xe8e   :  { %v823_v41 = vmul.f32 %v1349_v39, %v821_v36  ;;  %v1351_v38 = vpop.eup %1350  ;;  %vm828_vm2 = vweird.f32 %v1349_v39 }
 0xe8f   :  { %v883_v28 = vmul.f32 %v1351_v38, %v881_v40  ;;  %vm829_vm6 = vmor %vm827_vm3, %vm828_vm2  ;;  %vm888_vm8 = vweird.f32 %v1351_v38 }
 0xe90   :  { %v824_v42 = vsub.f32 1.0, %v823_v41  ;;  %vm889_vm10 = vmor %vm887_vm9, %vm888_vm8 }
 0xe91   :  { %v884_v45 = vsub.f32 1.0, %v883_v28 }
 0xe92   :  { %v825_v43 = vmul.f32 %v1349_v39, %v824_v42 }
 0xe93   :  { %v885_v1 = vmul.f32 %v1351_v38, %v884_v45 }
 0xe94   :  { %v826_v27 = vadd.f32 %v1349_v39, %v825_v43 }
 0xe95   :  { %v886_v49 = vadd.f32 %v1351_v38, %v885_v1 }
 0xe96   :  { %v830_v33 = vsel %vm829_vm6, %v1349_v39, %v826_v27 }
 0xe97   :  { %v835_v48 = vsel %vm832_vm7, %v834_v46, %v830_v33  ;;  %v890_v52 = vsel %vm889_vm10, %v1351_v38, %v886_v49 }
 0xe98   :  { %v895_v54 = vsel %vm892_vm11, %v894_v53, %v890_v52  ;;  %v838_v61 = vmul.f32 %v835_v48, %v1716_v7 }
 0xe99   :  { %v898_v57 = vmul.f32 %v895_v54, %v1712_v4 }
 0xedd   :  { %v841_v47 = vpop.permute.xlu2 %840 }
 0xede   :  { %v843_v0 = vmul.f32 %v841_v47, %v835_v48 }
 0xee0   :  { %845 = vrot.lane.b32.xlu1 %v843_v0, %s1495_s0 }
 0xeea   :  { %v901_v55 = vpop.permute.xlu0 %900 }
 0xeeb   :  { %v903_v56 = vmul.f32 %v901_v55, %v895_v54 }
 0xeed   :  { %905 = vrot.lane.b32.xlu2 %v903_v56, %s1495_s0 }
 0xf47   :  { %v906_v58 = vpop.permute.xlu2 %905 }
 0xf48   :  { %v1733_v59 = vadd.f32 %v906_v58, %v898_v57 }
 0xf4a   :  { %1352 = vtanh.f32 %v1733_v59 }
 0xf50   :  { %v1353_v60 = vpop.eup %1352 }
 0xf51   :  { %911 = vrot.lane.b32.xlu1 %v1353_v60, %s1488_s29 }
 0xf52   :  { %v846_v62 = vpop.permute.xlu1 %845 }
 0xf53   :  { %v1738_v63 = vadd.f32 %v846_v62, %v838_v61 }
 0xf55   :  { %1354 = vtanh.f32 %v1738_v63 }
 0xf5b   :  { %v1355_v2 = vpop.eup %1354 }
 0xf5c   :  { %851 = vrot.lane.b32.xlu0 %v1355_v2, %s1488_s29 }
 0xfc3   :  { %v912_v3 = vpop.permute.xlu1 %911 }
 0xfc4   :  { %v914_v4 = vmul.f32 %v912_v3, %v895_v54 }
 0xfc6   :  { %v980_v5 = vpack.c.bf16 %v914_v4, %v914_v4  ;;  %916 = vrot.lane.b32.xlu2 %v914_v4, %s1495_s0 }
 0xfc8   :  { %982 = vrot.lane.b32.xlu1 %v980_v5, %s1495_s0 }
 0xfce   :  { %v852_v6 = vpop.permute.xlu0 %851 }
 0xfcf   :  { %v854_v8 = vmul.f32 %v852_v6, %v835_v48 }
 0xfd1   :  { %920 = vrot.lane.b32.xlu0 %v854_v8, %s1488_s29 }
0x1020   :  { %v917_v9 = vpop.permute.xlu2 %916 }
0x103a   :  { %v983_v7 = vpop.permute.xlu1 %982 }
0x103b   :  { %1227 = vmatmul.msk.bf16.vlgmr.msrb.gmra.mxu1 %vm93_vm4, %v983_v7 }
0x1043   :  { %v921_v11 = vpop.permute.xlu0 %920 }
0x1044   :  { %v923_v12 = vsel %vm93_vm4, %v917_v9, %v921_v11 }
0x1045   :  { %v924_v13 = vpack.c.bf16 %v923_v12, %v923_v12 }
0x1047   :  { %1225 = vmatmul.msk.bf16.vlgmr.msrb.gmra.mxu2 %vm186_vm5, %v924_v13 }
0x10b8   :  { %v996_v15 = vpop.f32.mrf.mxu1 }
0x10b9   :  { %v1000_v10 = vadd.f32 %v996_v15, %v979_v14 }
0x10bb   :  { %1356 = vtanh.f32 %v1000_v10  ;;  %v1228_v18 = vmul.f32 -1.442695, %v1000_v10 }
0x10c0   :  { %v998_v17 = vpop.f32.mrf.mxu1 }
0x10c1   :  { %v1357_v16 = vpop.eup %1356 }
0x10c2   :  { %1023 = vrot.lane.b32.xlu0 %v1357_v16, %s1488_s29 }
0x10ca   :  { %v937_v20 = vpop.f32.mrf.mxu2 }
0x10cb   :  { %v938_v23 = vadd.f32 %v1752_v21, %v937_v20 }
0x10cd   :  { %1358 = vtanh.f32 %v938_v23  ;;  %v1226_v19 = vmul.f32 -1.442695, %v938_v23 }
0x10cf   :  { %1360 = vpow2.f32 %v1226_v19 }
0x10d0   :  { %1362 = vpow2.f32 %v1228_v18 }
0x10d2   :  { %v939_v26 = vpop.f32.mrf.mxu2 }
0x10d3   :  { %v1359_v30 = vpop.eup %1358 }
0x10d4   :  { %963 = vrot.lane.b32.xlu2 %v1359_v30, %s1488_s29 }
0x10d5   :  { %v1361_v31 = vpop.eup %1360 }
0x10d6   :  { %v944_v32 = vadd.f32 1.0, %v1361_v31  ;;  %v1363_v24 = vpop.eup %1362 }
0x10d7   :  { %v1004_v25 = vadd.f32 1.0, %v1363_v24 }
0x10d8   :  { %1364 = vrcp.f32 %v944_v32  ;;  %v956_v42 = vand.u32 2147483648, %v944_v32  ;;  %vm950_vm13 = vweird.f32 %v944_v32  ;;  %v954_v38 = vand.u32 2147483647, %v944_v32 }
0x10d9   :  { %1366 = vrcp.f32 %v1004_v25  ;;  %v1016_v29 = vand.u32 2147483648, %v1004_v25  ;;  %vm1010_vm1 = vweird.f32 %v1004_v25  ;;  %v1014_v46 = vand.u32 2147483647, %v1004_v25 }
0x10da   :  { %v957_v28 = vor.u32 1.1754944e-38, %v956_v42  ;;  %vm955_vm0 = vcmp.eq.f32.partialorder %v954_v38, 8.507059e+37 }
0x10db   :  { %v1017_v0 = vor.u32 1.1754944e-38, %v1016_v29  ;;  %vm1015_vm3 = vcmp.eq.f32.partialorder %v1014_v46, 8.507059e+37  ;;  %v1250_v29 = vld [vmem:[%s1789_s4] ss:$0 sm:$0xff]  ;;  %s1498_s4 = smov [#allocation8]  }
0x10de   :  { %v1365_v22 = vpop.eup %1364 }
0x10df   :  { %v946_v34 = vmul.f32 %v1365_v22, %v944_v32  ;;  %v1367_v35 = vpop.eup %1366  ;;  %vm951_vm12 = vweird.f32 %v1365_v22 }
0x10e0   :  { %v1006_v37 = vmul.f32 %v1367_v35, %v1004_v25  ;;  %vm952_vm14 = vmor %vm950_vm13, %vm951_vm12  ;;  %vm1011_vm15 = vweird.f32 %v1367_v35 }
0x10e1   :  { %v947_v36 = vsub.f32 1.0, %v946_v34  ;;  %vm1012_vm2 = vmor %vm1010_vm1, %vm1011_vm15 }
0x10e2   :  { %v1007_v40 = vsub.f32 1.0, %v1006_v37 }
0x10e3   :  { %v948_v39 = vmul.f32 %v1365_v22, %v947_v36  ;;  %v1496_v36 = vmov 32.0  }
0x10e4   :  { %v1008_v43 = vmul.f32 %v1367_v35, %v1007_v40 }
0x10e5   :  { %v949_v41 = vadd.f32 %v1365_v22, %v948_v39 }
0x10e6   :  { %v1009_v44 = vadd.f32 %v1367_v35, %v1008_v43 }
0x10e7   :  { %v953_v27 = vsel %vm952_vm14, %v1365_v22, %v949_v41 }
0x10e8   :  { %v958_v45 = vsel %vm955_vm0, %v957_v28, %v953_v27  ;;  %v1013_v48 = vsel %vm1012_vm2, %v1367_v35, %v1009_v44 }
0x10e9   :  { %v1018_v1 = vsel %vm1015_vm3, %v1017_v0, %v1013_v48  ;;  %v961_v55 = vmul.f32 %v958_v45, %v1738_v63 }
0x10ea   :  { %v1021_v51 = vmul.f32 %v1018_v1, %v1733_v59 }
0x112e   :  { %v964_v33 = vpop.permute.xlu2 %963 }
0x112f   :  { %v966_v47 = vmul.f32 %v964_v33, %v958_v45  ;;  %v1251_v33 = vld [vmem:[%s1790_s5] ss:$0 sm:$0xff]  ;;  %s1163_s5 = sshll.u32 %s1498_s4, 4  ;;  %s1164_s5 = int_to_ptr.vmem [resolvable:$true] %s1163_s5 }
0x1131   :  { %968 = vrot.lane.b32.xlu1 %v966_v47, %s1495_s0 }
0x1134   :  { %v1024_v49 = vpop.permute.xlu0 %1023 }
0x1135   :  { %v1026_v50 = vmul.f32 %v1024_v49, %v1018_v1 }
0x1137   :  { %1028 = vrot.lane.b32.xlu2 %v1026_v50, %s1495_s0 }
0x1191   :  { %v1029_v52 = vpop.permute.xlu2 %1028 }
0x1192   :  { %v1031_v53 = vadd.f32 %v1029_v52, %v1021_v51 }
0x1194   :  { %1368 = vtanh.f32 %v1031_v53 }
0x119a   :  { %v1369_v54 = vpop.eup %1368 }
0x119b   :  { %1034 = vrot.lane.b32.xlu1 %v1369_v54, %s1488_s29 }
0x11a3   :  { %v969_v56 = vpop.permute.xlu1 %968 }
0x11a4   :  { %v971_v57 = vadd.f32 %v969_v56, %v961_v55 }
0x11a6   :  { %1370 = vtanh.f32 %v971_v57 }
0x11ac   :  { %v1371_v58 = vpop.eup %1370 }
0x11ad   :  { %974 = vrot.lane.b32.xlu0 %v1371_v58, %s1488_s29 }
0x120d   :  { %v1035_v60 = vpop.permute.xlu1 %1034 }
0x120e   :  { %v1037_v61 = vmul.f32 %v1035_v60, %v1018_v1 }
0x1210   :  { %1039 = vrot.lane.b32.xlu2 %v1037_v61, %s1495_s0 }
0x121f   :  { %v975_v62 = vpop.permute.xlu0 %974 }
0x1220   :  { %v977_v59 = vmul.f32 %v975_v62, %v958_v45 }
0x1222   :  { %1043 = vrot.lane.b32.xlu0 %v977_v59, %s1488_s29 }
0x126a   :  { %v1040_v2 = vpop.permute.xlu2 %1039 }
0x1294   :  { %v1044_v3 = vpop.permute.xlu0 %1043 }
0x1295   :  { %v1046_v4 = vsel %vm93_vm4, %v1040_v2, %v1044_v3 }
0x1296   :  { %v1047_v5 = vpack.c.bf16 %v1046_v4, %v1046_v4 }
0x1298   :  { %1229 = vmatmul.msk.bf16.vlgmr.msrb.gmra.mxu3 %vm186_vm5, %v1047_v5 }
0x131b   :  { %v1060_v63 = vpop.f32.mrf.mxu3 }
0x131c   :  { %v1061_v6 = vadd.f32 %v1752_v21, %v1060_v63 }
0x131e   :  { %1372 = vtanh.f32 %v1061_v6  ;;  %v1230_v9 = vmul.f32 -1.442695, %v1061_v6 }
0x1320   :  { %1374 = vpow2.f32 %v1230_v9 }
0x1323   :  { %v1062_v8 = vpop.f32.mrf.mxu3 }
0x1324   :  { %v1373_v7 = vpop.eup %1372 }
0x1325   :  { %1086 = vrot.lane.b32.xlu1 %v1373_v7, %s1488_s29 }
0x1326   :  { %v1375_v11 = vpop.eup %1374 }
0x1327   :  { %v1067_v12 = vadd.f32 1.0, %v1375_v11 }
0x1329   :  { %1376 = vrcp.f32 %v1067_v12  ;;  %v1079_v16 = vand.u32 2147483648, %v1067_v12  ;;  %vm1073_vm5 = vweird.f32 %v1067_v12  ;;  %v1077_v20 = vand.u32 2147483647, %v1067_v12 }
0x132b   :  { %v1080_v23 = vor.u32 1.1754944e-38, %v1079_v16  ;;  %vm1078_vm8 = vcmp.eq.f32.partialorder %v1077_v20, 8.507059e+37 }
0x132f   :  { %v1377_v13 = vpop.eup %1376 }
0x1330   :  { %v1069_v14 = vmul.f32 %v1377_v13, %v1067_v12  ;;  %vm1074_vm6 = vweird.f32 %v1377_v13 }
0x1331   :  { %vm1075_vm7 = vmor %vm1073_vm5, %vm1074_vm6 }
0x1332   :  { %v1070_v15 = vsub.f32 1.0, %v1069_v14 }
0x1334   :  { %v1071_v10 = vmul.f32 %v1377_v13, %v1070_v15 }
0x1336   :  { %v1072_v17 = vadd.f32 %v1377_v13, %v1071_v10 }
0x1338   :  { %v1076_v21 = vsel %vm1075_vm7, %v1377_v13, %v1072_v17 }
0x1339   :  { %v1081_v30 = vsel %vm1078_vm8, %v1080_v23, %v1076_v21 }
0x133a   :  { %v1084_v18 = vmul.f32 %v1081_v30, %v971_v57 }
0x1397   :  { %v1087_v26 = vpop.permute.xlu1 %1086 }
0x1398   :  { %v1089_v19 = vmul.f32 %v1087_v26, %v1081_v30 }
0x139a   :  { %1091 = vrot.lane.b32.xlu2 %v1089_v19, %s1495_s0 }
0x13f4   :  { %v1092_v31 = vpop.permute.xlu2 %1091 }
0x13f5   :  { %v1094_v32 = vadd.f32 %v1092_v31, %v1084_v18 }
0x13f7   :  { %1378 = vtanh.f32 %v1094_v32 }
0x13f8   :  { %1380 = vrcp.f32 %v1496_v36 }
0x13fd   :  { %v1379_v24 = vpop.eup %1378 }
0x13fe   :  { %1097 = vrot.lane.b32.xlu0 %v1379_v24, %s1488_s29  ;;  %v1381_v37 = vpop.eup %1380 }
0x13ff   :  { %v1109_v39 = vmul.f32 32.0, %v1381_v37  ;;  %vm1113_vm9 = vweird.f32 %v1381_v37 }
0x1401   :  { %v1110_v40 = vsub.f32 1.0, %v1109_v39 }
0x1403   :  { %v1111_v41 = vmul.f32 %v1381_v37, %v1110_v40 }
0x1405   :  { %v1112_v42 = vadd.f32 %v1381_v37, %v1111_v41 }
0x1407   :  { %v1114_v43 = vsel %vm1113_vm9, %v1381_v37, %v1112_v42 }
0x1470   :  { %v1098_v25 = vpop.permute.xlu0 %1097 }
0x1471   :  { %v1100_v22 = vmul.f32 %v1098_v25, %v1081_v30 }
0x1473   :  { %1102 = vrot.lane.b32.xlu1 %v1100_v22, %s1495_s0 }
0x14e5   :  { %v1103_v34 = vpop.permute.xlu1 %1102 }
0x14e6   :  { %v1105_v35 = vsel %vm93_vm4, %v1103_v34, 0.0 }
0x14e7   :  { %1106 = vadd.xlane.f32.xlu2 %v1105_v35 }
0x155a   :  { %v1107_v38 = vpop.xlane.xlu2 %1106 }
0x155b   :  { %v1115_v27 = vmul.f32 %v1114_v43, %v1107_v38 }
0x155d   :  { %v1116_v28 = vsub.f32 %v1100_v22, %v1115_v27 }
0x155f   :  { %v1117_v44 = vmul.f32 %v1116_v28, %v1116_v28 }
0x1561   :  { %1119 = vrot.lane.b32.xlu0 %v1117_v44, %s1495_s0 }
0x1569   :  { %1141 = vrot.lane.b32.xlu0 %v1250_v29, %s1497_s19 }
0x1571   :  { %1148 = vrot.lane.b32.xlu0 %v1251_v33, %s1497_s19 }
0x15d3   :  { %v1120_v45 = vpop.permute.xlu0 %1119 }
0x15d4   :  { %v1122_v46 = vsel %vm93_vm4, %v1120_v45, 0.0 }
0x15d5   :  { %1123 = vadd.xlane.f32.xlu1 %v1122_v46 }
0x15db   :  { %v1142_v51 = vpop.permute.xlu0 %1141 }
0x15e3   :  { %v1149_v57 = vpop.permute.xlu0 %1148 }
0x1648   :  { %v1124_v47 = vpop.xlane.xlu1 %1123 }
0x1649   :  { %v1125_v48 = vmul.f32 %v1124_v47, %v1114_v43 }
0x164b   :  { %v1126_v0 = vadd.f32 1e-05, %v1125_v48 }
0x164d   :  { %1382 = vrsqrt.f32 %v1126_v0  ;;  %vm1133_vm11 = vweird.f32 %v1126_v0 }
0x1653   :  { %v1383_v1 = vpop.eup %1382 }
0x1654   :  { %v1128_v49 = vmul.f32 %v1383_v1, %v1126_v0  ;;  %vm1134_vm10 = vweird.f32 %v1383_v1 }
0x1655   :  { %vm1135_vm12 = vmor %vm1133_vm11, %vm1134_vm10 }
0x1656   :  { %v1129_v50 = vmul.f32 %v1383_v1, %v1128_v49 }
0x1658   :  { %v1130_v52 = vmul.f32 0.5, %v1129_v50 }
0x165a   :  { %v1131_v53 = vsub.f32 1.5, %v1130_v52 }
0x165c   :  { %v1132_v54 = vmul.f32 %v1383_v1, %v1131_v53 }
0x165e   :  { %v1136_v55 = vsel %vm1135_vm12, %v1383_v1, %v1132_v54 }
0x165f   :  { %v1137_v56 = vmul.f32 %v1136_v55, %v1116_v28 }
0x1661   :  { %v1144_v58 = vmul.f32 %v1142_v51, %v1137_v56 }
0x1663   :  { %v1151_v60 = vadd.f32 %v1149_v57, %v1144_v58 }
0x1665   :  { %1153 = vrot.lane.b32.xlu0 %v1151_v60, %s1495_s0 }
0x16d7   :  { %v1154_v61 = vpop.permute.xlu0 %1153 }
0x16d8   :  { %v1156_v62 = vsel %vm93_vm4, %v1154_v61, 0.0 }
0x16d9   :  { %1157 = vst [vmem:[#allocation8] sm:$0xff] %v1156_v62 }
0x16da   :  { %1168 = dma.vmem_to_hbm [thread:$0]  %s1164_s5, 128, %s1166_s24, [#allocation4]  }
0x16db   :  { %1485 = dma.done.wait [#allocation4], 128  }
0x16dc   :  { %1486 = vsyncadd [#allocation4], 4294967168 }
0x16dd   :  { %1173 = vsyncpa [#allocation3], 1 }
0x16de   :  { %1174 = vsyncpa [#allocation6], 1 }
0x16df   :  { %1175 = vsyncpa [#allocation4], 1 }

</bundles_post_ra>
